<compile_context>
chip_gen: v7x
topology: tpu7x:2x2x1
jax: 0.10.0
libtpu: 0.0.40
codegen_flags: <defaults>
</compile_context>

<pallas_src>
import functools

import jax
import jax.numpy as jnp
from jax import lax
from jax.experimental import pallas as pl
from jax.experimental.pallas import tpu as pltpu


def _round_up(x, m):
    return ((x + m - 1) // m) * m


def _decoder_lstm_kernel(x_ref, wih_ref, b_ref, whh_ref, wv_ref, bv_ref,
                         h0_ref, c0_ref,
                         logp_ref, hT_ref, cT_ref,
                         h_state, c_state, xw_ref, hseq_ref, *,
                         chunk, batch_p, hidden, seq_len):
    """One time-chunk of the decoder recurrence.

    x_ref    : [St, Bp, E]   embedded inputs for this chunk (time-major)
    wih_ref  : [E, G4]       input weights  (4H padded to G4 lanes)
    b_ref    : [1, G4]       fused bias (b_ih + b_hh)
    whh_ref  : [H, G4]       recurrent weights
    wv_ref   : [H, Vp]       hidden2vocab weights (vocab padded lane-dense)
    bv_ref   : [1, Vp]       hidden2vocab bias (padding lanes = -1e30)
    logp_ref : [St, Bp, Vp]  per-step log-softmax output for this chunk
    hT/cT    : [Bp, H]       final hidden / cell state (written every chunk)
    h_state/c_state : persistent VMEM carry across grid steps
    xw_ref   : [St, Bp, G4]  scratch: hoisted input projections
    hseq_ref : [St, Bp, H]   scratch: per-step hidden states of this chunk
    """
    s = pl.program_id(0)
    H = hidden

    @pl.when(s == 0)
    def _():
        h_state[...] = h0_ref[...]
        c_state[...] = c0_ref[...]

    # ---- Phase 1: input projection for the whole chunk (one MXU pass) -------
    # Not recurrent, so batch it over St*Bp rows and fold the bias in here.
    x_flat = x_ref[...].reshape(chunk * batch_p, -1)                 # [St*Bp, E]
    xw = jnp.dot(x_flat, wih_ref[...],
                 preferred_element_type=jnp.float32) + b_ref[...]    # [St*Bp, G4]
    xw_ref[...] = xw.reshape(chunk, batch_p, -1)

    # ---- Phase 2: the actual recurrence (only h @ W_hh is serialized) -------
    def step(t, carry):
        h, c = carry
        gates = xw_ref[t] + jnp.dot(h, whh_ref[...],
                                    preferred_element_type=jnp.float32)
        # PyTorch gate order: input, forget, cell, output.
        i_g = jax.nn.sigmoid(gates[:, 0 * H:1 * H])
        f_g = jax.nn.sigmoid(gates[:, 1 * H:2 * H])
        g_g = jnp.tanh(gates[:, 2 * H:3 * H])
        o_g = jax.nn.sigmoid(gates[:, 3 * H:4 * H])
        c_new = f_g * c + i_g * g_g
        h_new = o_g * jnp.tanh(c_new)
        # Mask steps in the time-padded tail so the carried final state is exact.
        keep = (s * chunk + t < seq_len).astype(jnp.float32)
        h_new = h + keep * (h_new - h)
        c_new = c + keep * (c_new - c)
        hseq_ref[t] = h_new
        return h_new, c_new

    h, c = lax.fori_loop(0, chunk, step, (h_state[...], c_state[...]),
                         unroll=True)                 # bounded unroll (= chunk)
    h_state[...] = h
    c_state[...] = c
    hT_ref[...] = h.astype(hT_ref.dtype)
    cT_ref[...] = c.astype(cT_ref.dtype)

    # ---- Phase 3: vocab projection + log-softmax, batched over the chunk ----
    h_flat = hseq_ref[...].reshape(chunk * batch_p, H)               # [St*Bp, H]
    logits = jnp.dot(h_flat, wv_ref[...],
                     preferred_element_type=jnp.float32) + bv_ref[...]
    m = jnp.max(logits, axis=-1, keepdims=True)
    z = logits - m
    lse = jnp.log(jnp.sum(jnp.exp(z), axis=-1, keepdims=True))
    logp_ref[...] = (z - lse).astype(logp_ref.dtype).reshape(chunk, batch_p, -1)


def decoder_lstm_forward(targets, encoder_hidden_and_cell, params,
                         seperator_index=2, time_chunk=8):
    """Full-teacher-forcing DecoderLSTM.forward (no attention, num_layers=1)."""
    h0_all, c0_all = encoder_hidden_and_cell                   # [1, B, H]
    B, T = targets.shape
    S = T + 1

    # make_input_sequences: prepend separator token.
    sep = jnp.full((B, 1), seperator_index, dtype=targets.dtype)
    inputs = jnp.concatenate([sep, targets], axis=1)           # [B, S]

    # Embedding lookup (gather), directly time-major; dropout = identity (eval).
    x_seq = params["embedding"][inputs.T].astype(jnp.float32)  # [S, B, E]

    E = x_seq.shape[-1]
    H = h0_all.shape[-1]
    V = params["w_hv"].shape[0]
    H4 = 4 * H
    G4 = _round_up(H4, 128)              # 4H padded as a whole (no per-gate pad)
    Vp = _round_up(V, 128)               # lane-dense padded vocab width
    Bp = _round_up(B, 8)                 # f32 sublane tile
    St = max(1, min(time_chunk, S))      # time chunk
    Sp = _round_up(S, St)

    # Padded inputs.
    x_p = jnp.zeros((Sp, Bp, E), jnp.float32).at[:S, :B].set(x_seq)
    h0 = jnp.zeros((Bp, H), jnp.float32).at[:B].set(h0_all[0].astype(jnp.float32))
    c0 = jnp.zeros((Bp, H), jnp.float32).at[:B].set(c0_all[0].astype(jnp.float32))

    # Weights: [*, 4H] padded to [*, G4]; vocab projection padded to Vp lanes,
    # padded bias lanes carry -1e30 so they never win the max / contribute to LSE.
    w_ih_p = jnp.zeros((E, G4), jnp.float32).at[:, :H4].set(
        params["w_ih"].T.astype(jnp.float32))
    b_p = jnp.zeros((1, G4), jnp.float32).at[0, :H4].set(
        (params["b_ih"] + params["b_hh"]).astype(jnp.float32))
    w_hh_p = jnp.zeros((H, G4), jnp.float32).at[:, :H4].set(
        params["w_hh"].T.astype(jnp.float32))
    w_hv_p = jnp.zeros((H, Vp), jnp.float32).at[:, :V].set(
        params["w_hv"].T.astype(jnp.float32))
    b_hv_p = jnp.full((1, Vp), -1e30, jnp.float32).at[0, :V].set(
        params["b_hv"].astype(jnp.float32))

    # Explicit VMEM budget from the actual block footprint (with headroom).
    f32b = 4
    vmem_bytes = (
        2 * St * Bp * E * f32b                                    # x (double-buffered)
        + 2 * St * Bp * Vp * f32b                                 # logp (double-buffered)
        + 2 * (E * G4 + G4 + H * G4 + H * Vp + Vp + 2 * Bp * H) * f32b   # params
        + 2 * 2 * Bp * H * f32b                                   # hT / cT
        + (2 * Bp * H + St * Bp * G4 + St * Bp * H) * f32b        # scratch
    )
    vmem_limit = int(min(max(2 * vmem_bytes, 32 * 1024 * 1024), 64 * 1024 * 1024))

    kernel = functools.partial(_decoder_lstm_kernel, chunk=St, batch_p=Bp,
                               hidden=H, seq_len=S)

    logp_tm, hT, cT = pl.pallas_call(
        kernel,
        out_shape=(
            jax.ShapeDtypeStruct((Sp, Bp, Vp), jnp.float32),
            jax.ShapeDtypeStruct((Bp, H), jnp.float32),
            jax.ShapeDtypeStruct((Bp, H), jnp.float32),
        ),
        grid_spec=pltpu.PrefetchScalarGridSpec(
            num_scalar_prefetch=0,
            grid=(Sp // St,),
            in_specs=[
                pl.BlockSpec((St, Bp, E), lambda s: (s, 0, 0)),      # x chunk
                pl.BlockSpec((E, G4), lambda s: (0, 0)),             # W_ih
                pl.BlockSpec((1, G4), lambda s: (0, 0)),             # fused bias
                pl.BlockSpec((H, G4), lambda s: (0, 0)),             # W_hh
                pl.BlockSpec((H, Vp), lambda s: (0, 0)),             # W_hv (padded)
                pl.BlockSpec((1, Vp), lambda s: (0, 0)),             # b_hv (padded)
                pl.BlockSpec((Bp, H), lambda s: (0, 0)),             # h0
                pl.BlockSpec((Bp, H), lambda s: (0, 0)),             # c0
            ],
            out_specs=[
                pl.BlockSpec((St, Bp, Vp), lambda s: (s, 0, 0)),     # log-probs chunk
                pl.BlockSpec((Bp, H), lambda s: (0, 0)),             # final h
                pl.BlockSpec((Bp, H), lambda s: (0, 0)),             # final c
            ],
            scratch_shapes=[
                pltpu.VMEM((Bp, H), jnp.float32),                    # h carry
                pltpu.VMEM((Bp, H), jnp.float32),                    # c carry
                pltpu.VMEM((St, Bp, G4), jnp.float32),               # hoisted x @ W_ih
                pltpu.VMEM((St, Bp, H), jnp.float32),                # per-step hidden
            ],
        ),
        compiler_params=pltpu.CompilerParams(
            dimension_semantics=("arbitrary",),
            vmem_limit_bytes=vmem_limit,
        ),
    )(x_p, w_ih_p, b_p, w_hh_p, w_hv_p, b_hv_p, h0, c0)

    # Back to batch_first [B, S, V] (slice padding off, tiny transpose);
    # final state returned as [1, B, H] like PyTorch's LSTM.
    logp = jnp.transpose(logp_tm[:S, :B, :V], (1, 0, 2))
    return logp, (hT[:B][None], cT[:B][None])


def _reference_forward(targets, encoder_hidden_and_cell, params, seperator_index=2):
    """Pure-JAX reference (lax.scan) for correctness checking."""
    h0_all, c0_all = encoder_hidden_and_cell
    B, T = targets.shape
    H = h0_all.shape[-1]
    sep = jnp.full((B, 1), seperator_index, dtype=targets.dtype)
    inputs = jnp.concatenate([sep, targets], axis=1)
    x_seq = jnp.transpose(params["embedding"][inputs], (1, 0, 2)).astype(jnp.float32)

    w_ih = params["w_ih"].T
    w_hh = params["w_hh"].T
    b = (params["b_ih"] + params["b_hh"])[None]
    w_hv = params["w_hv"].T
    b_hv = params["b_hv"][None]

    def step(carry, x):
        h, c = carry
        gates = x @ w_ih + h @ w_hh + b
        i = jax.nn.sigmoid(gates[:, 0 * H:1 * H])
        f = jax.nn.sigmoid(gates[:, 1 * H:2 * H])
        g = jnp.tanh(gates[:, 2 * H:3 * H])
        o = jax.nn.sigmoid(gates[:, 3 * H:4 * H])
        c_new = f * c + i * g
        h_new = o * jnp.tanh(c_new)
        logits = h_new @ w_hv + b_hv
        logp = jax.nn.log_softmax(logits, axis=-1)
        return (h_new, c_new), logp

    (hT, cT), logps = lax.scan(step, (h0_all[0].astype(jnp.float32),
                                      c0_all[0].astype(jnp.float32)), x_seq)
    return jnp.transpose(logps, (1, 0, 2)), (hT[None], cT[None])


if __name__ == "__main__":
    # Small shapes consistent with the module: batch=4, target_seq=8,
    # vocab=64, embedding=32, hidden=32, num_layers=1.
    B, T, V, E, H = 4, 8, 64, 32, 32

    key = jax.random.PRNGKey(0)
    k_emb, k_wih, k_whh, k_bih, k_bhh, k_whv, k_bhv, k_tgt, k_h, k_c = (
        jax.random.split(key, 10))

    bound = 1.0 / jnp.sqrt(H)
    params = {
        "embedding": jax.random.normal(k_emb, (V, E), jnp.float32),
        "w_ih": jax.random.uniform(k_wih, (4 * H, E), jnp.float32, -bound, bound),
        "w_hh": jax.random.uniform(k_whh, (4 * H, H), jnp.float32, -bound, bound),
        "b_ih": jax.random.uniform(k_bih, (4 * H,), jnp.float32, -bound, bound),
        "b_hh": jax.random.uniform(k_bhh, (4 * H,), jnp.float32, -bound, bound),
        "w_hv": jax.random.uniform(k_whv, (V, H), jnp.float32, -bound, bound),
        "b_hv": jax.random.uniform(k_bhv, (V,), jnp.float32, -bound, bound),
    }

    targets = jax.random.randint(k_tgt, (B, T), minval=4, maxval=V, dtype=jnp.int32)
    h0 = jax.random.normal(k_h, (1, B, H), jnp.float32)
    c0 = jax.random.normal(k_c, (1, B, H), jnp.float32)

    logp, (hT, cT) = decoder_lstm_forward(targets, (h0, c0), params)
    jax.block_until_ready((logp, hT, cT))

    logp_ref, (hT_ref, cT_ref) = _reference_forward(targets, (h0, c0), params)
    assert logp.shape == (B, T + 1, V)
    assert hT.shape == (1, B, H) and cT.shape == (1, B, H)
    assert jnp.allclose(logp, logp_ref, atol=1e-4, rtol=1e-4)
    assert jnp.allclose(hT, hT_ref, atol=1e-4, rtol=1e-4)
    assert jnp.allclose(cT, cT_ref, atol=1e-4, rtol=1e-4)

    print("KERNEL_OK")
</pallas_src>

<mosaic_0001>
module attributes {stable_mosaic.version = 11 : i64} {
  func.func @_decoder_lstm_kernel(%arg0: i32, %arg1: memref<8x8x32xf32, #tpu.memory_space<vmem>>, %arg2: memref<32x128xf32, #tpu.memory_space<vmem>>, %arg3: memref<1x128xf32, #tpu.memory_space<vmem>>, %arg4: memref<32x128xf32, #tpu.memory_space<vmem>>, %arg5: memref<32x128xf32, #tpu.memory_space<vmem>>, %arg6: memref<1x128xf32, #tpu.memory_space<vmem>>, %arg7: memref<8x32xf32, #tpu.memory_space<vmem>>, %arg8: memref<8x32xf32, #tpu.memory_space<vmem>>, %arg9: memref<8x8x128xf32, #tpu.memory_space<vmem>>, %arg10: memref<8x32xf32, #tpu.memory_space<vmem>>, %arg11: memref<8x32xf32, #tpu.memory_space<vmem>>, %arg12: memref<8x32xf32, #tpu.memory_space<vmem>>, %arg13: memref<8x32xf32, #tpu.memory_space<vmem>>, %arg14: memref<8x8x128xf32, #tpu.memory_space<vmem>>, %arg15: memref<8x8x32xf32, #tpu.memory_space<vmem>>) attributes {dimension_semantics = [#tpu.dimension_semantics<arbitrary>], iteration_bounds = array<i64: 2>, scalar_prefetch = 0 : i64, scratch_operands = 4 : i64, tpu.core_type = #tpu.core_type<tc>, window_params = [{transform_indices = @transform_0, window_bounds = array<i64: 8, 8, 32>}, {pipeline_mode = #tpu.pipeline_mode<synchronous>, transform_indices = @transform_1, window_bounds = array<i64: 32, 128>}, {pipeline_mode = #tpu.pipeline_mode<synchronous>, transform_indices = @transform_2, window_bounds = array<i64: 1, 128>}, {pipeline_mode = #tpu.pipeline_mode<synchronous>, transform_indices = @transform_3, window_bounds = array<i64: 32, 128>}, {pipeline_mode = #tpu.pipeline_mode<synchronous>, transform_indices = @transform_4, window_bounds = array<i64: 32, 128>}, {pipeline_mode = #tpu.pipeline_mode<synchronous>, transform_indices = @transform_5, window_bounds = array<i64: 1, 128>}, {pipeline_mode = #tpu.pipeline_mode<synchronous>, transform_indices = @transform_6, window_bounds = array<i64: 8, 32>}, {pipeline_mode = #tpu.pipeline_mode<synchronous>, transform_indices = @transform_7, window_bounds = array<i64: 8, 32>}, {transform_indices = @transform_8, window_bounds = array<i64: 8, 8, 128>}, {pipeline_mode = #tpu.pipeline_mode<synchronous>, transform_indices = @transform_9, window_bounds = array<i64: 8, 32>}, {pipeline_mode = #tpu.pipeline_mode<synchronous>, transform_indices = @transform_10, window_bounds = array<i64: 8, 32>}]} {
    %c0_i32 = arith.constant 0 : i32
    %0 = arith.cmpi eq, %arg0, %c0_i32 : i32
    %1 = arith.extui %0 : i1 to i32
    %c0_i32_0 = arith.constant 0 : i32
    %2 = arith.cmpi ne, %1, %c0_i32_0 : i32
    scf.if %2 {
      %c0_131 = arith.constant 0 : index
      %c0_132 = arith.constant 0 : index
      %421 = vector.load %arg7[%c0_131, %c0_132] : memref<8x32xf32, #tpu.memory_space<vmem>>, vector<8x32xf32>
      %c0_133 = arith.constant 0 : index
      %c0_134 = arith.constant 0 : index
      %422 = vector.load %arg12[%c0_133, %c0_134] : memref<8x32xf32, #tpu.memory_space<vmem>>, vector<8x32xf32>
      tpu.vector_store %arg12[%c0_133, %c0_134], %421 {strides = array<i32>} : memref<8x32xf32, #tpu.memory_space<vmem>>, vector<8x32xf32>,
      %c0_135 = arith.constant 0 : index
      %c0_136 = arith.constant 0 : index
      %423 = vector.load %arg8[%c0_135, %c0_136] : memref<8x32xf32, #tpu.memory_space<vmem>>, vector<8x32xf32>
      %c0_137 = arith.constant 0 : index
      %c0_138 = arith.constant 0 : index
      %424 = vector.load %arg13[%c0_137, %c0_138] : memref<8x32xf32, #tpu.memory_space<vmem>>, vector<8x32xf32>
      tpu.vector_store %arg13[%c0_137, %c0_138], %423 {strides = array<i32>} : memref<8x32xf32, #tpu.memory_space<vmem>>, vector<8x32xf32>,
    } else {
    }
    %c0 = arith.constant 0 : index
    %c0_1 = arith.constant 0 : index
    %c0_2 = arith.constant 0 : index
    %3 = vector.load %arg1[%c0, %c0_1, %c0_2] : memref<8x8x32xf32, #tpu.memory_space<vmem>>, vector<8x8x32xf32>
    %4 = vector.shape_cast %3 : vector<8x8x32xf32> to vector<64x32xf32>
    %c0_3 = arith.constant 0 : index
    %c0_4 = arith.constant 0 : index
    %5 = vector.load %arg2[%c0_3, %c0_4] : memref<32x128xf32, #tpu.memory_space<vmem>>, vector<32x128xf32>
    %cst = arith.constant dense<0.000000e+00> : vector<64x128xf32>
    %6 = tpu.matmul %4, %5, %cst {dimension_numbers = #tpu.dot_dimension_numbers<[1], [0], [0], [1], [0, 0, 1, 1], [], []>} : vector<64x32xf32>, vector<32x128xf32>, vector<64x128xf32> -> vector<64x128xf32>
    %c0_5 = arith.constant 0 : index
    %c0_6 = arith.constant 0 : index
    %7 = vector.load %arg3[%c0_5, %c0_6] : memref<1x128xf32, #tpu.memory_space<vmem>>, vector<1x128xf32>
    %8 = vector.broadcast %7 : vector<1x128xf32> to vector<64x128xf32>
    %9 = arith.addf %6, %8 : vector<64x128xf32>
    %10 = vector.shape_cast %9 : vector<64x128xf32> to vector<8x8x128xf32>
    %c0_7 = arith.constant 0 : index
    %c0_8 = arith.constant 0 : index
    %c0_9 = arith.constant 0 : index
    %11 = vector.load %arg14[%c0_7, %c0_8, %c0_9] : memref<8x8x128xf32, #tpu.memory_space<vmem>>, vector<8x8x128xf32>
    tpu.vector_store %arg14[%c0_7, %c0_8, %c0_9], %10 {strides = array<i32>} : memref<8x8x128xf32, #tpu.memory_space<vmem>>, vector<8x8x128xf32>,
    %c0_10 = arith.constant 0 : index
    %c0_11 = arith.constant 0 : index
    %12 = vector.load %arg12[%c0_10, %c0_11] : memref<8x32xf32, #tpu.memory_space<vmem>>, vector<8x32xf32>
    %c0_12 = arith.constant 0 : index
    %c0_13 = arith.constant 0 : index
    %13 = vector.load %arg13[%c0_12, %c0_13] : memref<8x32xf32, #tpu.memory_space<vmem>>, vector<8x32xf32>
    %c0_i32_14 = arith.constant 0 : i32
    %14 = arith.index_cast %c0_i32_14 : i32 to index
    %c0_15 = arith.constant 0 : index
    %c0_16 = arith.constant 0 : index
    %15 = vector.load %arg14[%14, %c0_15, %c0_16] : memref<8x8x128xf32, #tpu.memory_space<vmem>>, vector<1x8x128xf32>
    %16 = vector.shape_cast %15 : vector<1x8x128xf32> to vector<8x128xf32>
    %c0_17 = arith.constant 0 : index
    %c0_18 = arith.constant 0 : index
    %17 = vector.load %arg4[%c0_17, %c0_18] : memref<32x128xf32, #tpu.memory_space<vmem>>, vector<32x128xf32>
    %cst_19 = arith.constant dense<0.000000e+00> : vector<8x128xf32>
    %18 = tpu.matmul %12, %17, %cst_19 {dimension_numbers = #tpu.dot_dimension_numbers<[1], [0], [0], [1], [0, 0, 1, 1], [], []>} : vector<8x32xf32>, vector<32x128xf32>, vector<8x128xf32> -> vector<8x128xf32>
    %19 = arith.addf %16, %18 : vector<8x128xf32>
    %20 = vector.extract_strided_slice %19 {offsets = [0, 0], sizes = [8, 32], strides = [1, 1]} : vector<8x128xf32> to vector<8x32xf32>
    %21 = arith.negf %20 : vector<8x32xf32>
    %22 = math.exp %21 : vector<8x32xf32>
    %cst_20 = arith.constant 1.000000e+00 : f32
    %23 = vector.broadcast %cst_20 : f32 to vector<8x32xf32>
    %24 = arith.addf %23, %22 : vector<8x32xf32>
    %25 = arith.divf %23, %24 : vector<8x32xf32>
    %26 = vector.extract_strided_slice %19 {offsets = [0, 32], sizes = [8, 32], strides = [1, 1]} : vector<8x128xf32> to vector<8x32xf32>
    %27 = arith.negf %26 : vector<8x32xf32>
    %28 = math.exp %27 : vector<8x32xf32>
    %cst_21 = arith.constant 1.000000e+00 : f32
    %29 = vector.broadcast %cst_21 : f32 to vector<8x32xf32>
    %30 = arith.addf %29, %28 : vector<8x32xf32>
    %31 = arith.divf %29, %30 : vector<8x32xf32>
    %32 = vector.extract_strided_slice %19 {offsets = [0, 64], sizes = [8, 32], strides = [1, 1]} : vector<8x128xf32> to vector<8x32xf32>
    %33 = math.tanh %32 : vector<8x32xf32>
    %34 = vector.extract_strided_slice %19 {offsets = [0, 96], sizes = [8, 32], strides = [1, 1]} : vector<8x128xf32> to vector<8x32xf32>
    %35 = arith.negf %34 : vector<8x32xf32>
    %36 = math.exp %35 : vector<8x32xf32>
    %cst_22 = arith.constant 1.000000e+00 : f32
    %37 = vector.broadcast %cst_22 : f32 to vector<8x32xf32>
    %38 = arith.addf %37, %36 : vector<8x32xf32>
    %39 = arith.divf %37, %38 : vector<8x32xf32>
    %40 = arith.mulf %31, %13 : vector<8x32xf32>
    %41 = arith.mulf %25, %33 : vector<8x32xf32>
    %42 = arith.addf %40, %41 : vector<8x32xf32>
    %43 = math.tanh %42 : vector<8x32xf32>
    %44 = arith.mulf %39, %43 : vector<8x32xf32>
    %c8_i32 = arith.constant 8 : i32
    %45 = arith.muli %arg0, %c8_i32 : i32
    %46 = arith.addi %45, %c0_i32_14 : i32
    %c9_i32 = arith.constant 9 : i32
    %47 = arith.cmpi slt, %46, %c9_i32 : i32
    %48 = arith.extui %47 : i1 to i32
    %49 = arith.sitofp %48 : i32 to f32
    %50 = arith.subf %44, %12 : vector<8x32xf32>
    %51 = vector.broadcast %49 : f32 to vector<8x32xf32>
    %52 = arith.mulf %51, %50 : vector<8x32xf32>
    %53 = arith.addf %12, %52 : vector<8x32xf32>
    %54 = arith.subf %42, %13 : vector<8x32xf32>
    %55 = vector.broadcast %49 : f32 to vector<8x32xf32>
    %56 = arith.mulf %55, %54 : vector<8x32xf32>
    %57 = arith.addf %13, %56 : vector<8x32xf32>
    %58 = arith.index_cast %c0_i32_14 : i32 to index
    %c0_23 = arith.constant 0 : index
    %c0_24 = arith.constant 0 : index
    %59 = vector.load %arg15[%58, %c0_23, %c0_24] : memref<8x8x32xf32, #tpu.memory_space<vmem>>, vector<1x8x32xf32>
    %60 = vector.shape_cast %59 : vector<1x8x32xf32> to vector<8x32xf32>
    %61 = vector.shape_cast %53 : vector<8x32xf32> to vector<1x8x32xf32>
    tpu.vector_store %arg15[%58, %c0_23, %c0_24], %61 {strides = array<i32>} : memref<8x8x32xf32, #tpu.memory_space<vmem>>, vector<1x8x32xf32>,
    %c1_i32 = arith.constant 1 : i32
    %62 = arith.index_cast %c1_i32 : i32 to index
    %c0_25 = arith.constant 0 : index
    %c0_26 = arith.constant 0 : index
    %63 = vector.load %arg14[%62, %c0_25, %c0_26] : memref<8x8x128xf32, #tpu.memory_space<vmem>>, vector<1x8x128xf32>
    %64 = vector.shape_cast %63 : vector<1x8x128xf32> to vector<8x128xf32>
    %c0_27 = arith.constant 0 : index
    %c0_28 = arith.constant 0 : index
    %65 = vector.load %arg4[%c0_27, %c0_28] : memref<32x128xf32, #tpu.memory_space<vmem>>, vector<32x128xf32>
    %cst_29 = arith.constant dense<0.000000e+00> : vector<8x128xf32>
    %66 = tpu.matmul %53, %65, %cst_29 {dimension_numbers = #tpu.dot_dimension_numbers<[1], [0], [0], [1], [0, 0, 1, 1], [], []>} : vector<8x32xf32>, vector<32x128xf32>, vector<8x128xf32> -> vector<8x128xf32>
    %67 = arith.addf %64, %66 : vector<8x128xf32>
    %68 = vector.extract_strided_slice %67 {offsets = [0, 0], sizes = [8, 32], strides = [1, 1]} : vector<8x128xf32> to vector<8x32xf32>
    %69 = arith.negf %68 : vector<8x32xf32>
    %70 = math.exp %69 : vector<8x32xf32>
    %cst_30 = arith.constant 1.000000e+00 : f32
    %71 = vector.broadcast %cst_30 : f32 to vector<8x32xf32>
    %72 = arith.addf %71, %70 : vector<8x32xf32>
    %73 = arith.divf %71, %72 : vector<8x32xf32>
    %74 = vector.extract_strided_slice %67 {offsets = [0, 32], sizes = [8, 32], strides = [1, 1]} : vector<8x128xf32> to vector<8x32xf32>
    %75 = arith.negf %74 : vector<8x32xf32>
    %76 = math.exp %75 : vector<8x32xf32>
    %cst_31 = arith.constant 1.000000e+00 : f32
    %77 = vector.broadcast %cst_31 : f32 to vector<8x32xf32>
    %78 = arith.addf %77, %76 : vector<8x32xf32>
    %79 = arith.divf %77, %78 : vector<8x32xf32>
    %80 = vector.extract_strided_slice %67 {offsets = [0, 64], sizes = [8, 32], strides = [1, 1]} : vector<8x128xf32> to vector<8x32xf32>
    %81 = math.tanh %80 : vector<8x32xf32>
    %82 = vector.extract_strided_slice %67 {offsets = [0, 96], sizes = [8, 32], strides = [1, 1]} : vector<8x128xf32> to vector<8x32xf32>
    %83 = arith.negf %82 : vector<8x32xf32>
    %84 = math.exp %83 : vector<8x32xf32>
    %cst_32 = arith.constant 1.000000e+00 : f32
    %85 = vector.broadcast %cst_32 : f32 to vector<8x32xf32>
    %86 = arith.addf %85, %84 : vector<8x32xf32>
    %87 = arith.divf %85, %86 : vector<8x32xf32>
    %88 = arith.mulf %79, %57 : vector<8x32xf32>
    %89 = arith.mulf %73, %81 : vector<8x32xf32>
    %90 = arith.addf %88, %89 : vector<8x32xf32>
    %91 = math.tanh %90 : vector<8x32xf32>
    %92 = arith.mulf %87, %91 : vector<8x32xf32>
    %c8_i32_33 = arith.constant 8 : i32
    %93 = arith.muli %arg0, %c8_i32_33 : i32
    %94 = arith.addi %93, %c1_i32 : i32
    %c9_i32_34 = arith.constant 9 : i32
    %95 = arith.cmpi slt, %94, %c9_i32_34 : i32
    %96 = arith.extui %95 : i1 to i32
    %97 = arith.sitofp %96 : i32 to f32
    %98 = arith.subf %92, %53 : vector<8x32xf32>
    %99 = vector.broadcast %97 : f32 to vector<8x32xf32>
    %100 = arith.mulf %99, %98 : vector<8x32xf32>
    %101 = arith.addf %53, %100 : vector<8x32xf32>
    %102 = arith.subf %90, %57 : vector<8x32xf32>
    %103 = vector.broadcast %97 : f32 to vector<8x32xf32>
    %104 = arith.mulf %103, %102 : vector<8x32xf32>
    %105 = arith.addf %57, %104 : vector<8x32xf32>
    %106 = arith.index_cast %c1_i32 : i32 to index
    %c0_35 = arith.constant 0 : index
    %c0_36 = arith.constant 0 : index
    %107 = vector.load %arg15[%106, %c0_35, %c0_36] : memref<8x8x32xf32, #tpu.memory_space<vmem>>, vector<1x8x32xf32>
    %108 = vector.shape_cast %107 : vector<1x8x32xf32> to vector<8x32xf32>
    %109 = vector.shape_cast %101 : vector<8x32xf32> to vector<1x8x32xf32>
    tpu.vector_store %arg15[%106, %c0_35, %c0_36], %109 {strides = array<i32>} : memref<8x8x32xf32, #tpu.memory_space<vmem>>, vector<1x8x32xf32>,
    %c2_i32 = arith.constant 2 : i32
    %110 = arith.index_cast %c2_i32 : i32 to index
    %c0_37 = arith.constant 0 : index
    %c0_38 = arith.constant 0 : index
    %111 = vector.load %arg14[%110, %c0_37, %c0_38] : memref<8x8x128xf32, #tpu.memory_space<vmem>>, vector<1x8x128xf32>
    %112 = vector.shape_cast %111 : vector<1x8x128xf32> to vector<8x128xf32>
    %c0_39 = arith.constant 0 : index
    %c0_40 = arith.constant 0 : index
    %113 = vector.load %arg4[%c0_39, %c0_40] : memref<32x128xf32, #tpu.memory_space<vmem>>, vector<32x128xf32>
    %cst_41 = arith.constant dense<0.000000e+00> : vector<8x128xf32>
    %114 = tpu.matmul %101, %113, %cst_41 {dimension_numbers = #tpu.dot_dimension_numbers<[1], [0], [0], [1], [0, 0, 1, 1], [], []>} : vector<8x32xf32>, vector<32x128xf32>, vector<8x128xf32> -> vector<8x128xf32>
    %115 = arith.addf %112, %114 : vector<8x128xf32>
    %116 = vector.extract_strided_slice %115 {offsets = [0, 0], sizes = [8, 32], strides = [1, 1]} : vector<8x128xf32> to vector<8x32xf32>
    %117 = arith.negf %116 : vector<8x32xf32>
    %118 = math.exp %117 : vector<8x32xf32>
    %cst_42 = arith.constant 1.000000e+00 : f32
    %119 = vector.broadcast %cst_42 : f32 to vector<8x32xf32>
    %120 = arith.addf %119, %118 : vector<8x32xf32>
    %121 = arith.divf %119, %120 : vector<8x32xf32>
    %122 = vector.extract_strided_slice %115 {offsets = [0, 32], sizes = [8, 32], strides = [1, 1]} : vector<8x128xf32> to vector<8x32xf32>
    %123 = arith.negf %122 : vector<8x32xf32>
    %124 = math.exp %123 : vector<8x32xf32>
    %cst_43 = arith.constant 1.000000e+00 : f32
    %125 = vector.broadcast %cst_43 : f32 to vector<8x32xf32>
    %126 = arith.addf %125, %124 : vector<8x32xf32>
    %127 = arith.divf %125, %126 : vector<8x32xf32>
    %128 = vector.extract_strided_slice %115 {offsets = [0, 64], sizes = [8, 32], strides = [1, 1]} : vector<8x128xf32> to vector<8x32xf32>
    %129 = math.tanh %128 : vector<8x32xf32>
    %130 = vector.extract_strided_slice %115 {offsets = [0, 96], sizes = [8, 32], strides = [1, 1]} : vector<8x128xf32> to vector<8x32xf32>
    %131 = arith.negf %130 : vector<8x32xf32>
    %132 = math.exp %131 : vector<8x32xf32>
    %cst_44 = arith.constant 1.000000e+00 : f32
    %133 = vector.broadcast %cst_44 : f32 to vector<8x32xf32>
    %134 = arith.addf %133, %132 : vector<8x32xf32>
    %135 = arith.divf %133, %134 : vector<8x32xf32>
    %136 = arith.mulf %127, %105 : vector<8x32xf32>
    %137 = arith.mulf %121, %129 : vector<8x32xf32>
    %138 = arith.addf %136, %137 : vector<8x32xf32>
    %139 = math.tanh %138 : vector<8x32xf32>
    %140 = arith.mulf %135, %139 : vector<8x32xf32>
    %c8_i32_45 = arith.constant 8 : i32
    %141 = arith.muli %arg0, %c8_i32_45 : i32
    %142 = arith.addi %141, %c2_i32 : i32
    %c9_i32_46 = arith.constant 9 : i32
    %143 = arith.cmpi slt, %142, %c9_i32_46 : i32
    %144 = arith.extui %143 : i1 to i32
    %145 = arith.sitofp %144 : i32 to f32
    %146 = arith.subf %140, %101 : vector<8x32xf32>
    %147 = vector.broadcast %145 : f32 to vector<8x32xf32>
    %148 = arith.mulf %147, %146 : vector<8x32xf32>
    %149 = arith.addf %101, %148 : vector<8x32xf32>
    %150 = arith.subf %138, %105 : vector<8x32xf32>
    %151 = vector.broadcast %145 : f32 to vector<8x32xf32>
    %152 = arith.mulf %151, %150 : vector<8x32xf32>
    %153 = arith.addf %105, %152 : vector<8x32xf32>
    %154 = arith.index_cast %c2_i32 : i32 to index
    %c0_47 = arith.constant 0 : index
    %c0_48 = arith.constant 0 : index
    %155 = vector.load %arg15[%154, %c0_47, %c0_48] : memref<8x8x32xf32, #tpu.memory_space<vmem>>, vector<1x8x32xf32>
    %156 = vector.shape_cast %155 : vector<1x8x32xf32> to vector<8x32xf32>
    %157 = vector.shape_cast %149 : vector<8x32xf32> to vector<1x8x32xf32>
    tpu.vector_store %arg15[%154, %c0_47, %c0_48], %157 {strides = array<i32>} : memref<8x8x32xf32, #tpu.memory_space<vmem>>, vector<1x8x32xf32>,
    %c3_i32 = arith.constant 3 : i32
    %158 = arith.index_cast %c3_i32 : i32 to index
    %c0_49 = arith.constant 0 : index
    %c0_50 = arith.constant 0 : index
    %159 = vector.load %arg14[%158, %c0_49, %c0_50] : memref<8x8x128xf32, #tpu.memory_space<vmem>>, vector<1x8x128xf32>
    %160 = vector.shape_cast %159 : vector<1x8x128xf32> to vector<8x128xf32>
    %c0_51 = arith.constant 0 : index
    %c0_52 = arith.constant 0 : index
    %161 = vector.load %arg4[%c0_51, %c0_52] : memref<32x128xf32, #tpu.memory_space<vmem>>, vector<32x128xf32>
    %cst_53 = arith.constant dense<0.000000e+00> : vector<8x128xf32>
    %162 = tpu.matmul %149, %161, %cst_53 {dimension_numbers = #tpu.dot_dimension_numbers<[1], [0], [0], [1], [0, 0, 1, 1], [], []>} : vector<8x32xf32>, vector<32x128xf32>, vector<8x128xf32> -> vector<8x128xf32>
    %163 = arith.addf %160, %162 : vector<8x128xf32>
    %164 = vector.extract_strided_slice %163 {offsets = [0, 0], sizes = [8, 32], strides = [1, 1]} : vector<8x128xf32> to vector<8x32xf32>
    %165 = arith.negf %164 : vector<8x32xf32>
    %166 = math.exp %165 : vector<8x32xf32>
    %cst_54 = arith.constant 1.000000e+00 : f32
    %167 = vector.broadcast %cst_54 : f32 to vector<8x32xf32>
    %168 = arith.addf %167, %166 : vector<8x32xf32>
    %169 = arith.divf %167, %168 : vector<8x32xf32>
    %170 = vector.extract_strided_slice %163 {offsets = [0, 32], sizes = [8, 32], strides = [1, 1]} : vector<8x128xf32> to vector<8x32xf32>
    %171 = arith.negf %170 : vector<8x32xf32>
    %172 = math.exp %171 : vector<8x32xf32>
    %cst_55 = arith.constant 1.000000e+00 : f32
    %173 = vector.broadcast %cst_55 : f32 to vector<8x32xf32>
    %174 = arith.addf %173, %172 : vector<8x32xf32>
    %175 = arith.divf %173, %174 : vector<8x32xf32>
    %176 = vector.extract_strided_slice %163 {offsets = [0, 64], sizes = [8, 32], strides = [1, 1]} : vector<8x128xf32> to vector<8x32xf32>
    %177 = math.tanh %176 : vector<8x32xf32>
    %178 = vector.extract_strided_slice %163 {offsets = [0, 96], sizes = [8, 32], strides = [1, 1]} : vector<8x128xf32> to vector<8x32xf32>
    %179 = arith.negf %178 : vector<8x32xf32>
    %180 = math.exp %179 : vector<8x32xf32>
    %cst_56 = arith.constant 1.000000e+00 : f32
    %181 = vector.broadcast %cst_56 : f32 to vector<8x32xf32>
    %182 = arith.addf %181, %180 : vector<8x32xf32>
    %183 = arith.divf %181, %182 : vector<8x32xf32>
    %184 = arith.mulf %175, %153 : vector<8x32xf32>
    %185 = arith.mulf %169, %177 : vector<8x32xf32>
    %186 = arith.addf %184, %185 : vector<8x32xf32>
    %187 = math.tanh %186 : vector<8x32xf32>
    %188 = arith.mulf %183, %187 : vector<8x32xf32>
    %c8_i32_57 = arith.constant 8 : i32
    %189 = arith.muli %arg0, %c8_i32_57 : i32
    %190 = arith.addi %189, %c3_i32 : i32
    %c9_i32_58 = arith.constant 9 : i32
    %191 = arith.cmpi slt, %190, %c9_i32_58 : i32
    %192 = arith.extui %191 : i1 to i32
    %193 = arith.sitofp %192 : i32 to f32
    %194 = arith.subf %188, %149 : vector<8x32xf32>
    %195 = vector.broadcast %193 : f32 to vector<8x32xf32>
    %196 = arith.mulf %195, %194 : vector<8x32xf32>
    %197 = arith.addf %149, %196 : vector<8x32xf32>
    %198 = arith.subf %186, %153 : vector<8x32xf32>
    %199 = vector.broadcast %193 : f32 to vector<8x32xf32>
    %200 = arith.mulf %199, %198 : vector<8x32xf32>
    %201 = arith.addf %153, %200 : vector<8x32xf32>
    %202 = arith.index_cast %c3_i32 : i32 to index
    %c0_59 = arith.constant 0 : index
    %c0_60 = arith.constant 0 : index
    %203 = vector.load %arg15[%202, %c0_59, %c0_60] : memref<8x8x32xf32, #tpu.memory_space<vmem>>, vector<1x8x32xf32>
    %204 = vector.shape_cast %203 : vector<1x8x32xf32> to vector<8x32xf32>
    %205 = vector.shape_cast %197 : vector<8x32xf32> to vector<1x8x32xf32>
    tpu.vector_store %arg15[%202, %c0_59, %c0_60], %205 {strides = array<i32>} : memref<8x8x32xf32, #tpu.memory_space<vmem>>, vector<1x8x32xf32>,
    %c4_i32 = arith.constant 4 : i32
    %206 = arith.index_cast %c4_i32 : i32 to index
    %c0_61 = arith.constant 0 : index
    %c0_62 = arith.constant 0 : index
    %207 = vector.load %arg14[%206, %c0_61, %c0_62] : memref<8x8x128xf32, #tpu.memory_space<vmem>>, vector<1x8x128xf32>
    %208 = vector.shape_cast %207 : vector<1x8x128xf32> to vector<8x128xf32>
    %c0_63 = arith.constant 0 : index
    %c0_64 = arith.constant 0 : index
    %209 = vector.load %arg4[%c0_63, %c0_64] : memref<32x128xf32, #tpu.memory_space<vmem>>, vector<32x128xf32>
    %cst_65 = arith.constant dense<0.000000e+00> : vector<8x128xf32>
    %210 = tpu.matmul %197, %209, %cst_65 {dimension_numbers = #tpu.dot_dimension_numbers<[1], [0], [0], [1], [0, 0, 1, 1], [], []>} : vector<8x32xf32>, vector<32x128xf32>, vector<8x128xf32> -> vector<8x128xf32>
    %211 = arith.addf %208, %210 : vector<8x128xf32>
    %212 = vector.extract_strided_slice %211 {offsets = [0, 0], sizes = [8, 32], strides = [1, 1]} : vector<8x128xf32> to vector<8x32xf32>
    %213 = arith.negf %212 : vector<8x32xf32>
    %214 = math.exp %213 : vector<8x32xf32>
    %cst_66 = arith.constant 1.000000e+00 : f32
    %215 = vector.broadcast %cst_66 : f32 to vector<8x32xf32>
    %216 = arith.addf %215, %214 : vector<8x32xf32>
    %217 = arith.divf %215, %216 : vector<8x32xf32>
    %218 = vector.extract_strided_slice %211 {offsets = [0, 32], sizes = [8, 32], strides = [1, 1]} : vector<8x128xf32> to vector<8x32xf32>
    %219 = arith.negf %218 : vector<8x32xf32>
    %220 = math.exp %219 : vector<8x32xf32>
    %cst_67 = arith.constant 1.000000e+00 : f32
    %221 = vector.broadcast %cst_67 : f32 to vector<8x32xf32>
    %222 = arith.addf %221, %220 : vector<8x32xf32>
    %223 = arith.divf %221, %222 : vector<8x32xf32>
    %224 = vector.extract_strided_slice %211 {offsets = [0, 64], sizes = [8, 32], strides = [1, 1]} : vector<8x128xf32> to vector<8x32xf32>
    %225 = math.tanh %224 : vector<8x32xf32>
    %226 = vector.extract_strided_slice %211 {offsets = [0, 96], sizes = [8, 32], strides = [1, 1]} : vector<8x128xf32> to vector<8x32xf32>
    %227 = arith.negf %226 : vector<8x32xf32>
    %228 = math.exp %227 : vector<8x32xf32>
    %cst_68 = arith.constant 1.000000e+00 : f32
    %229 = vector.broadcast %cst_68 : f32 to vector<8x32xf32>
    %230 = arith.addf %229, %228 : vector<8x32xf32>
    %231 = arith.divf %229, %230 : vector<8x32xf32>
    %232 = arith.mulf %223, %201 : vector<8x32xf32>
    %233 = arith.mulf %217, %225 : vector<8x32xf32>
    %234 = arith.addf %232, %233 : vector<8x32xf32>
    %235 = math.tanh %234 : vector<8x32xf32>
    %236 = arith.mulf %231, %235 : vector<8x32xf32>
    %c8_i32_69 = arith.constant 8 : i32
    %237 = arith.muli %arg0, %c8_i32_69 : i32
    %238 = arith.addi %237, %c4_i32 : i32
    %c9_i32_70 = arith.constant 9 : i32
    %239 = arith.cmpi slt, %238, %c9_i32_70 : i32
    %240 = arith.extui %239 : i1 to i32
    %241 = arith.sitofp %240 : i32 to f32
    %242 = arith.subf %236, %197 : vector<8x32xf32>
    %243 = vector.broadcast %241 : f32 to vector<8x32xf32>
    %244 = arith.mulf %243, %242 : vector<8x32xf32>
    %245 = arith.addf %197, %244 : vector<8x32xf32>
    %246 = arith.subf %234, %201 : vector<8x32xf32>
    %247 = vector.broadcast %241 : f32 to vector<8x32xf32>
    %248 = arith.mulf %247, %246 : vector<8x32xf32>
    %249 = arith.addf %201, %248 : vector<8x32xf32>
    %250 = arith.index_cast %c4_i32 : i32 to index
    %c0_71 = arith.constant 0 : index
    %c0_72 = arith.constant 0 : index
    %251 = vector.load %arg15[%250, %c0_71, %c0_72] : memref<8x8x32xf32, #tpu.memory_space<vmem>>, vector<1x8x32xf32>
    %252 = vector.shape_cast %251 : vector<1x8x32xf32> to vector<8x32xf32>
    %253 = vector.shape_cast %245 : vector<8x32xf32> to vector<1x8x32xf32>
    tpu.vector_store %arg15[%250, %c0_71, %c0_72], %253 {strides = array<i32>} : memref<8x8x32xf32, #tpu.memory_space<vmem>>, vector<1x8x32xf32>,
    %c5_i32 = arith.constant 5 : i32
    %254 = arith.index_cast %c5_i32 : i32 to index
    %c0_73 = arith.constant 0 : index
    %c0_74 = arith.constant 0 : index
    %255 = vector.load %arg14[%254, %c0_73, %c0_74] : memref<8x8x128xf32, #tpu.memory_space<vmem>>, vector<1x8x128xf32>
    %256 = vector.shape_cast %255 : vector<1x8x128xf32> to vector<8x128xf32>
    %c0_75 = arith.constant 0 : index
    %c0_76 = arith.constant 0 : index
    %257 = vector.load %arg4[%c0_75, %c0_76] : memref<32x128xf32, #tpu.memory_space<vmem>>, vector<32x128xf32>
    %cst_77 = arith.constant dense<0.000000e+00> : vector<8x128xf32>
    %258 = tpu.matmul %245, %257, %cst_77 {dimension_numbers = #tpu.dot_dimension_numbers<[1], [0], [0], [1], [0, 0, 1, 1], [], []>} : vector<8x32xf32>, vector<32x128xf32>, vector<8x128xf32> -> vector<8x128xf32>
    %259 = arith.addf %256, %258 : vector<8x128xf32>
    %260 = vector.extract_strided_slice %259 {offsets = [0, 0], sizes = [8, 32], strides = [1, 1]} : vector<8x128xf32> to vector<8x32xf32>
    %261 = arith.negf %260 : vector<8x32xf32>
    %262 = math.exp %261 : vector<8x32xf32>
    %cst_78 = arith.constant 1.000000e+00 : f32
    %263 = vector.broadcast %cst_78 : f32 to vector<8x32xf32>
    %264 = arith.addf %263, %262 : vector<8x32xf32>
    %265 = arith.divf %263, %264 : vector<8x32xf32>
    %266 = vector.extract_strided_slice %259 {offsets = [0, 32], sizes = [8, 32], strides = [1, 1]} : vector<8x128xf32> to vector<8x32xf32>
    %267 = arith.negf %266 : vector<8x32xf32>
    %268 = math.exp %267 : vector<8x32xf32>
    %cst_79 = arith.constant 1.000000e+00 : f32
    %269 = vector.broadcast %cst_79 : f32 to vector<8x32xf32>
    %270 = arith.addf %269, %268 : vector<8x32xf32>
    %271 = arith.divf %269, %270 : vector<8x32xf32>
    %272 = vector.extract_strided_slice %259 {offsets = [0, 64], sizes = [8, 32], strides = [1, 1]} : vector<8x128xf32> to vector<8x32xf32>
    %273 = math.tanh %272 : vector<8x32xf32>
    %274 = vector.extract_strided_slice %259 {offsets = [0, 96], sizes = [8, 32], strides = [1, 1]} : vector<8x128xf32> to vector<8x32xf32>
    %275 = arith.negf %274 : vector<8x32xf32>
    %276 = math.exp %275 : vector<8x32xf32>
    %cst_80 = arith.constant 1.000000e+00 : f32
    %277 = vector.broadcast %cst_80 : f32 to vector<8x32xf32>
    %278 = arith.addf %277, %276 : vector<8x32xf32>
    %279 = arith.divf %277, %278 : vector<8x32xf32>
    %280 = arith.mulf %271, %249 : vector<8x32xf32>
    %281 = arith.mulf %265, %273 : vector<8x32xf32>
    %282 = arith.addf %280, %281 : vector<8x32xf32>
    %283 = math.tanh %282 : vector<8x32xf32>
    %284 = arith.mulf %279, %283 : vector<8x32xf32>
    %c8_i32_81 = arith.constant 8 : i32
    %285 = arith.muli %arg0, %c8_i32_81 : i32
    %286 = arith.addi %285, %c5_i32 : i32
    %c9_i32_82 = arith.constant 9 : i32
    %287 = arith.cmpi slt, %286, %c9_i32_82 : i32
    %288 = arith.extui %287 : i1 to i32
    %289 = arith.sitofp %288 : i32 to f32
    %290 = arith.subf %284, %245 : vector<8x32xf32>
    %291 = vector.broadcast %289 : f32 to vector<8x32xf32>
    %292 = arith.mulf %291, %290 : vector<8x32xf32>
    %293 = arith.addf %245, %292 : vector<8x32xf32>
    %294 = arith.subf %282, %249 : vector<8x32xf32>
    %295 = vector.broadcast %289 : f32 to vector<8x32xf32>
    %296 = arith.mulf %295, %294 : vector<8x32xf32>
    %297 = arith.addf %249, %296 : vector<8x32xf32>
    %298 = arith.index_cast %c5_i32 : i32 to index
    %c0_83 = arith.constant 0 : index
    %c0_84 = arith.constant 0 : index
    %299 = vector.load %arg15[%298, %c0_83, %c0_84] : memref<8x8x32xf32, #tpu.memory_space<vmem>>, vector<1x8x32xf32>
    %300 = vector.shape_cast %299 : vector<1x8x32xf32> to vector<8x32xf32>
    %301 = vector.shape_cast %293 : vector<8x32xf32> to vector<1x8x32xf32>
    tpu.vector_store %arg15[%298, %c0_83, %c0_84], %301 {strides = array<i32>} : memref<8x8x32xf32, #tpu.memory_space<vmem>>, vector<1x8x32xf32>,
    %c6_i32 = arith.constant 6 : i32
    %302 = arith.index_cast %c6_i32 : i32 to index
    %c0_85 = arith.constant 0 : index
    %c0_86 = arith.constant 0 : index
    %303 = vector.load %arg14[%302, %c0_85, %c0_86] : memref<8x8x128xf32, #tpu.memory_space<vmem>>, vector<1x8x128xf32>
    %304 = vector.shape_cast %303 : vector<1x8x128xf32> to vector<8x128xf32>
    %c0_87 = arith.constant 0 : index
    %c0_88 = arith.constant 0 : index
    %305 = vector.load %arg4[%c0_87, %c0_88] : memref<32x128xf32, #tpu.memory_space<vmem>>, vector<32x128xf32>
    %cst_89 = arith.constant dense<0.000000e+00> : vector<8x128xf32>
    %306 = tpu.matmul %293, %305, %cst_89 {dimension_numbers = #tpu.dot_dimension_numbers<[1], [0], [0], [1], [0, 0, 1, 1], [], []>} : vector<8x32xf32>, vector<32x128xf32>, vector<8x128xf32> -> vector<8x128xf32>
    %307 = arith.addf %304, %306 : vector<8x128xf32>
    %308 = vector.extract_strided_slice %307 {offsets = [0, 0], sizes = [8, 32], strides = [1, 1]} : vector<8x128xf32> to vector<8x32xf32>
    %309 = arith.negf %308 : vector<8x32xf32>
    %310 = math.exp %309 : vector<8x32xf32>
    %cst_90 = arith.constant 1.000000e+00 : f32
    %311 = vector.broadcast %cst_90 : f32 to vector<8x32xf32>
    %312 = arith.addf %311, %310 : vector<8x32xf32>
    %313 = arith.divf %311, %312 : vector<8x32xf32>
    %314 = vector.extract_strided_slice %307 {offsets = [0, 32], sizes = [8, 32], strides = [1, 1]} : vector<8x128xf32> to vector<8x32xf32>
    %315 = arith.negf %314 : vector<8x32xf32>
    %316 = math.exp %315 : vector<8x32xf32>
    %cst_91 = arith.constant 1.000000e+00 : f32
    %317 = vector.broadcast %cst_91 : f32 to vector<8x32xf32>
    %318 = arith.addf %317, %316 : vector<8x32xf32>
    %319 = arith.divf %317, %318 : vector<8x32xf32>
    %320 = vector.extract_strided_slice %307 {offsets = [0, 64], sizes = [8, 32], strides = [1, 1]} : vector<8x128xf32> to vector<8x32xf32>
    %321 = math.tanh %320 : vector<8x32xf32>
    %322 = vector.extract_strided_slice %307 {offsets = [0, 96], sizes = [8, 32], strides = [1, 1]} : vector<8x128xf32> to vector<8x32xf32>
    %323 = arith.negf %322 : vector<8x32xf32>
    %324 = math.exp %323 : vector<8x32xf32>
    %cst_92 = arith.constant 1.000000e+00 : f32
    %325 = vector.broadcast %cst_92 : f32 to vector<8x32xf32>
    %326 = arith.addf %325, %324 : vector<8x32xf32>
    %327 = arith.divf %325, %326 : vector<8x32xf32>
    %328 = arith.mulf %319, %297 : vector<8x32xf32>
    %329 = arith.mulf %313, %321 : vector<8x32xf32>
    %330 = arith.addf %328, %329 : vector<8x32xf32>
    %331 = math.tanh %330 : vector<8x32xf32>
    %332 = arith.mulf %327, %331 : vector<8x32xf32>
    %c8_i32_93 = arith.constant 8 : i32
    %333 = arith.muli %arg0, %c8_i32_93 : i32
    %334 = arith.addi %333, %c6_i32 : i32
    %c9_i32_94 = arith.constant 9 : i32
    %335 = arith.cmpi slt, %334, %c9_i32_94 : i32
    %336 = arith.extui %335 : i1 to i32
    %337 = arith.sitofp %336 : i32 to f32
    %338 = arith.subf %332, %293 : vector<8x32xf32>
    %339 = vector.broadcast %337 : f32 to vector<8x32xf32>
    %340 = arith.mulf %339, %338 : vector<8x32xf32>
    %341 = arith.addf %293, %340 : vector<8x32xf32>
    %342 = arith.subf %330, %297 : vector<8x32xf32>
    %343 = vector.broadcast %337 : f32 to vector<8x32xf32>
    %344 = arith.mulf %343, %342 : vector<8x32xf32>
    %345 = arith.addf %297, %344 : vector<8x32xf32>
    %346 = arith.index_cast %c6_i32 : i32 to index
    %c0_95 = arith.constant 0 : index
    %c0_96 = arith.constant 0 : index
    %347 = vector.load %arg15[%346, %c0_95, %c0_96] : memref<8x8x32xf32, #tpu.memory_space<vmem>>, vector<1x8x32xf32>
    %348 = vector.shape_cast %347 : vector<1x8x32xf32> to vector<8x32xf32>
    %349 = vector.shape_cast %341 : vector<8x32xf32> to vector<1x8x32xf32>
    tpu.vector_store %arg15[%346, %c0_95, %c0_96], %349 {strides = array<i32>} : memref<8x8x32xf32, #tpu.memory_space<vmem>>, vector<1x8x32xf32>,
    %c7_i32 = arith.constant 7 : i32
    %350 = arith.index_cast %c7_i32 : i32 to index
    %c0_97 = arith.constant 0 : index
    %c0_98 = arith.constant 0 : index
    %351 = vector.load %arg14[%350, %c0_97, %c0_98] : memref<8x8x128xf32, #tpu.memory_space<vmem>>, vector<1x8x128xf32>
    %352 = vector.shape_cast %351 : vector<1x8x128xf32> to vector<8x128xf32>
    %c0_99 = arith.constant 0 : index
    %c0_100 = arith.constant 0 : index
    %353 = vector.load %arg4[%c0_99, %c0_100] : memref<32x128xf32, #tpu.memory_space<vmem>>, vector<32x128xf32>
    %cst_101 = arith.constant dense<0.000000e+00> : vector<8x128xf32>
    %354 = tpu.matmul %341, %353, %cst_101 {dimension_numbers = #tpu.dot_dimension_numbers<[1], [0], [0], [1], [0, 0, 1, 1], [], []>} : vector<8x32xf32>, vector<32x128xf32>, vector<8x128xf32> -> vector<8x128xf32>
    %355 = arith.addf %352, %354 : vector<8x128xf32>
    %356 = vector.extract_strided_slice %355 {offsets = [0, 0], sizes = [8, 32], strides = [1, 1]} : vector<8x128xf32> to vector<8x32xf32>
    %357 = arith.negf %356 : vector<8x32xf32>
    %358 = math.exp %357 : vector<8x32xf32>
    %cst_102 = arith.constant 1.000000e+00 : f32
    %359 = vector.broadcast %cst_102 : f32 to vector<8x32xf32>
    %360 = arith.addf %359, %358 : vector<8x32xf32>
    %361 = arith.divf %359, %360 : vector<8x32xf32>
    %362 = vector.extract_strided_slice %355 {offsets = [0, 32], sizes = [8, 32], strides = [1, 1]} : vector<8x128xf32> to vector<8x32xf32>
    %363 = arith.negf %362 : vector<8x32xf32>
    %364 = math.exp %363 : vector<8x32xf32>
    %cst_103 = arith.constant 1.000000e+00 : f32
    %365 = vector.broadcast %cst_103 : f32 to vector<8x32xf32>
    %366 = arith.addf %365, %364 : vector<8x32xf32>
    %367 = arith.divf %365, %366 : vector<8x32xf32>
    %368 = vector.extract_strided_slice %355 {offsets = [0, 64], sizes = [8, 32], strides = [1, 1]} : vector<8x128xf32> to vector<8x32xf32>
    %369 = math.tanh %368 : vector<8x32xf32>
    %370 = vector.extract_strided_slice %355 {offsets = [0, 96], sizes = [8, 32], strides = [1, 1]} : vector<8x128xf32> to vector<8x32xf32>
    %371 = arith.negf %370 : vector<8x32xf32>
    %372 = math.exp %371 : vector<8x32xf32>
    %cst_104 = arith.constant 1.000000e+00 : f32
    %373 = vector.broadcast %cst_104 : f32 to vector<8x32xf32>
    %374 = arith.addf %373, %372 : vector<8x32xf32>
    %375 = arith.divf %373, %374 : vector<8x32xf32>
    %376 = arith.mulf %367, %345 : vector<8x32xf32>
    %377 = arith.mulf %361, %369 : vector<8x32xf32>
    %378 = arith.addf %376, %377 : vector<8x32xf32>
    %379 = math.tanh %378 : vector<8x32xf32>
    %380 = arith.mulf %375, %379 : vector<8x32xf32>
    %c8_i32_105 = arith.constant 8 : i32
    %381 = arith.muli %arg0, %c8_i32_105 : i32
    %382 = arith.addi %381, %c7_i32 : i32
    %c9_i32_106 = arith.constant 9 : i32
    %383 = arith.cmpi slt, %382, %c9_i32_106 : i32
    %384 = arith.extui %383 : i1 to i32
    %385 = arith.sitofp %384 : i32 to f32
    %386 = arith.subf %380, %341 : vector<8x32xf32>
    %387 = vector.broadcast %385 : f32 to vector<8x32xf32>
    %388 = arith.mulf %387, %386 : vector<8x32xf32>
    %389 = arith.addf %341, %388 : vector<8x32xf32>
    %390 = arith.subf %378, %345 : vector<8x32xf32>
    %391 = vector.broadcast %385 : f32 to vector<8x32xf32>
    %392 = arith.mulf %391, %390 : vector<8x32xf32>
    %393 = arith.addf %345, %392 : vector<8x32xf32>
    %394 = arith.index_cast %c7_i32 : i32 to index
    %c0_107 = arith.constant 0 : index
    %c0_108 = arith.constant 0 : index
    %395 = vector.load %arg15[%394, %c0_107, %c0_108] : memref<8x8x32xf32, #tpu.memory_space<vmem>>, vector<1x8x32xf32>
    %396 = vector.shape_cast %395 : vector<1x8x32xf32> to vector<8x32xf32>
    %397 = vector.shape_cast %389 : vector<8x32xf32> to vector<1x8x32xf32>
    tpu.vector_store %arg15[%394, %c0_107, %c0_108], %397 {strides = array<i32>} : memref<8x8x32xf32, #tpu.memory_space<vmem>>, vector<1x8x32xf32>,
    %c8_i32_109 = arith.constant 8 : i32
    %c0_110 = arith.constant 0 : index
    %c0_111 = arith.constant 0 : index
    %398 = vector.load %arg12[%c0_110, %c0_111] : memref<8x32xf32, #tpu.memory_space<vmem>>, vector<8x32xf32>
    tpu.vector_store %arg12[%c0_110, %c0_111], %389 {strides = array<i32>} : memref<8x32xf32, #tpu.memory_space<vmem>>, vector<8x32xf32>,
    %c0_112 = arith.constant 0 : index
    %c0_113 = arith.constant 0 : index
    %399 = vector.load %arg13[%c0_112, %c0_113] : memref<8x32xf32, #tpu.memory_space<vmem>>, vector<8x32xf32>
    tpu.vector_store %arg13[%c0_112, %c0_113], %393 {strides = array<i32>} : memref<8x32xf32, #tpu.memory_space<vmem>>, vector<8x32xf32>,
    %c0_114 = arith.constant 0 : index
    %c0_115 = arith.constant 0 : index
    %400 = vector.load %arg10[%c0_114, %c0_115] : memref<8x32xf32, #tpu.memory_space<vmem>>, vector<8x32xf32>
    tpu.vector_store %arg10[%c0_114, %c0_115], %389 {strides = array<i32>} : memref<8x32xf32, #tpu.memory_space<vmem>>, vector<8x32xf32>,
    %c0_116 = arith.constant 0 : index
    %c0_117 = arith.constant 0 : index
    %401 = vector.load %arg11[%c0_116, %c0_117] : memref<8x32xf32, #tpu.memory_space<vmem>>, vector<8x32xf32>
    tpu.vector_store %arg11[%c0_116, %c0_117], %393 {strides = array<i32>} : memref<8x32xf32, #tpu.memory_space<vmem>>, vector<8x32xf32>,
    %c0_118 = arith.constant 0 : index
    %c0_119 = arith.constant 0 : index
    %c0_120 = arith.constant 0 : index
    %402 = vector.load %arg15[%c0_118, %c0_119, %c0_120] : memref<8x8x32xf32, #tpu.memory_space<vmem>>, vector<8x8x32xf32>
    %403 = vector.shape_cast %402 : vector<8x8x32xf32> to vector<64x32xf32>
    %c0_121 = arith.constant 0 : index
    %c0_122 = arith.constant 0 : index
    %404 = vector.load %arg5[%c0_121, %c0_122] : memref<32x128xf32, #tpu.memory_space<vmem>>, vector<32x128xf32>
    %cst_123 = arith.constant dense<0.000000e+00> : vector<64x128xf32>
    %405 = tpu.matmul %403, %404, %cst_123 {dimension_numbers = #tpu.dot_dimension_numbers<[1], [0], [0], [1], [0, 0, 1, 1], [], []>} : vector<64x32xf32>, vector<32x128xf32>, vector<64x128xf32> -> vector<64x128xf32>
    %c0_124 = arith.constant 0 : index
    %c0_125 = arith.constant 0 : index
    %406 = vector.load %arg6[%c0_124, %c0_125] : memref<1x128xf32, #tpu.memory_space<vmem>>, vector<1x128xf32>
    %407 = vector.broadcast %406 : vector<1x128xf32> to vector<64x128xf32>
    %408 = arith.addf %405, %407 : vector<64x128xf32>
    %cst_126 = arith.constant dense<0xFF800000> : vector<64xf32>
    %409 = vector.multi_reduction <maximumf>, %408, %cst_126 [1] : vector<64x128xf32> to vector<64xf32>
    %410 = vector.shape_cast %409 : vector<64xf32> to vector<64x1xf32>
    %411 = vector.broadcast %410 : vector<64x1xf32> to vector<64x128xf32>
    %412 = arith.subf %408, %411 : vector<64x128xf32>
    %413 = math.exp %412 : vector<64x128xf32>
    %cst_127 = arith.constant dense<0.000000e+00> : vector<64xf32>
    %414 = vector.multi_reduction <add>, %413, %cst_127 [1] : vector<64x128xf32> to vector<64xf32>
    %415 = vector.shape_cast %414 : vector<64xf32> to vector<64x1xf32>
    %416 = math.log %415 : vector<64x1xf32>
    %417 = vector.broadcast %416 : vector<64x1xf32> to vector<64x128xf32>
    %418 = arith.subf %412, %417 : vector<64x128xf32>
    %419 = vector.shape_cast %418 : vector<64x128xf32> to vector<8x8x128xf32>
    %c0_128 = arith.constant 0 : index
    %c0_129 = arith.constant 0 : index
    %c0_130 = arith.constant 0 : index
    %420 = vector.load %arg9[%c0_128, %c0_129, %c0_130] : memref<8x8x128xf32, #tpu.memory_space<vmem>>, vector<8x8x128xf32>
    tpu.vector_store %arg9[%c0_128, %c0_129, %c0_130], %419 {strides = array<i32>} : memref<8x8x128xf32, #tpu.memory_space<vmem>>, vector<8x8x128xf32>,
    return
  }
  func.func @transform_0(%arg0: i32) -> (i32, i32, i32) {
    %c0_i32 = arith.constant 0 : i32
    %c0_i32_0 = arith.constant 0 : i32
    %c0_i32_1 = arith.constant 0 : i32
    return %arg0, %c0_i32, %c0_i32_0 : i32, i32, i32
  }
  func.func @transform_1(%arg0: i32) -> (i32, i32) {
    %c0_i32 = arith.constant 0 : i32
    %c0_i32_0 = arith.constant 0 : i32
    %c0_i32_1 = arith.constant 0 : i32
    return %c0_i32, %c0_i32_0 : i32, i32
  }
  func.func @transform_2(%arg0: i32) -> (i32, i32) {
    %c0_i32 = arith.constant 0 : i32
    %c0_i32_0 = arith.constant 0 : i32
    %c0_i32_1 = arith.constant 0 : i32
    return %c0_i32, %c0_i32_0 : i32, i32
  }
  func.func @transform_3(%arg0: i32) -> (i32, i32) {
    %c0_i32 = arith.constant 0 : i32
    %c0_i32_0 = arith.constant 0 : i32
    %c0_i32_1 = arith.constant 0 : i32
    return %c0_i32, %c0_i32_0 : i32, i32
  }
  func.func @transform_4(%arg0: i32) -> (i32, i32) {
    %c0_i32 = arith.constant 0 : i32
    %c0_i32_0 = arith.constant 0 : i32
    %c0_i32_1 = arith.constant 0 : i32
    return %c0_i32, %c0_i32_0 : i32, i32
  }
  func.func @transform_5(%arg0: i32) -> (i32, i32) {
    %c0_i32 = arith.constant 0 : i32
    %c0_i32_0 = arith.constant 0 : i32
    %c0_i32_1 = arith.constant 0 : i32
    return %c0_i32, %c0_i32_0 : i32, i32
  }
  func.func @transform_6(%arg0: i32) -> (i32, i32) {
    %c0_i32 = arith.constant 0 : i32
    %c0_i32_0 = arith.constant 0 : i32
    %c0_i32_1 = arith.constant 0 : i32
    return %c0_i32, %c0_i32_0 : i32, i32
  }
  func.func @transform_7(%arg0: i32) -> (i32, i32) {
    %c0_i32 = arith.constant 0 : i32
    %c0_i32_0 = arith.constant 0 : i32
    %c0_i32_1 = arith.constant 0 : i32
    return %c0_i32, %c0_i32_0 : i32, i32
  }
  func.func @transform_8(%arg0: i32) -> (i32, i32, i32) {
    %c0_i32 = arith.constant 0 : i32
    %c0_i32_0 = arith.constant 0 : i32
    %c0_i32_1 = arith.constant 0 : i32
    return %arg0, %c0_i32, %c0_i32_0 : i32, i32, i32
  }
  func.func @transform_9(%arg0: i32) -> (i32, i32) {
    %c0_i32 = arith.constant 0 : i32
    %c0_i32_0 = arith.constant 0 : i32
    %c0_i32_1 = arith.constant 0 : i32
    return %c0_i32, %c0_i32_0 : i32, i32
  }
  func.func @transform_10(%arg0: i32) -> (i32, i32) {
    %c0_i32 = arith.constant 0 : i32
    %c0_i32_0 = arith.constant 0 : i32
    %c0_i32_1 = arith.constant 0 : i32
    return %c0_i32, %c0_i32_0 : i32, i32
  }
}

</mosaic_0001>

<bundles_post_ra>
// kernel: tpu_custom_call.1
= control target key start
LH: loop header
LB: loop body
LE: loop exit
PB: predicated region body
PF: predicated region fallthrough
CT: control target
= control target key end

     0   :  { %s3496_s0 = inlined_call_operand.hbm [shape: f32[16,8,32], index: 0, kind: input, shape index: {}]   ;;  %s3497_s1 = inlined_call_operand.hbm [shape: f32[32,128], index: 1, kind: input, shape index: {}]   ;;  %s3498_s2 = inlined_call_operand.vmem [shape: f32[1,128], index: 2, kind: input, shape index: {}]   ;;  %s3499_s3 = inlined_call_operand.hbm [shape: f32[32,128], index: 3, kind: input, shape index: {}]   ;;  %s3500_s4 = inlined_call_operand.hbm [shape: f32[32,128], index: 4, kind: input, shape index: {}]   ;;  %s3501_s5 = inlined_call_operand.vmem [shape: f32[1,128], index: 5, kind: input, shape index: {}]   ;;  %s3502_s6 = inlined_call_operand.vmem [shape: f32[8,32], index: 6, kind: input, shape index: {}]   ;;  %s3503_s7 = inlined_call_operand.vmem [shape: f32[8,32], index: 7, kind: input, shape index: {}]   ;;  %s3504_s8 = inlined_call_operand.hbm [shape: f32[16,8,128], index: 8, kind: output, shape index: {0}]   ;;  %s3505_s9 = inlined_call_operand.hbm [shape: f32[8,32], index: 9, kind: output, shape index: {1}]   ;;  %s3506_s10 = inlined_call_operand.hbm [shape: f32[8,32], index: 10, kind: output, shape index: {2}]  }
   0x1   :  { %3514 = sst [smem:[#allocation25_spill]] %s3504_s8 }
   0x2   :  { %3515 = sst [smem:[#allocation26_spill]] %s3506_s10 }
   0x3   :  { %16 = vsyncpa [#allocation7], 0 }
   0x4   :  { %18 = vsyncpa [#allocation7 + $0x1], 0 }
   0x5   :  { %19 = vsyncpa [#allocation10], 0 }
   0x6   :  { %20 = vsyncpa [#allocation13], 0 }
   0x7   :  { %21 = vsyncpa [#allocation8], 0 }
   0x8   :  { %23 = vsyncpa [#allocation8 + $0x1], 0 }
   0x9   :  { %24 = vsyncpa [#allocation16], 0  ;;  %s2878_s13 = smov 0   ;;  %s2880_s14 = smov 0  }
   0xa   :  { %s2882_s15 = smov 0   ;;  %s2884_s16 = smov 0  }
   0xb LB: > { %3516 = sst [smem:[#allocation23_spill]] %s2792_s13  ;;  %s2899_s17 = sadd.s32 4294967295, %s2804_s16   ;;  %s2804_s16 = sphi %s2884_s16, %s3550_s16   ;;  %s2800_s15 = sphi %s2882_s15, %s3549_s15   ;;  %s2796_s14 = sphi %s2880_s14, %s3548_s14   ;;  %s2792_s13 = sphi %s2878_s13, %s3547_s13  }
   0xc   : > { %s2041_s18 = sadd.s32 4294967294, %s2804_s16   ;;  %p50_p0 = scmp.ne.s32.totalorder %s2796_s14, %s2792_s13 }
   0xd   : > { %p3507_p1 = scmp.eq.s32.totalorder %s2899_s17, 0  ;;  %p227_p3 = scmp.eq.s32.totalorder %s2041_s18, 1 }
   0xe   : > { %p2042_p5 = scmp.ge.s32.totalorder %s2804_s16, 1  ;;  %p276_p7 = scmp.lt.s32.totalorder %s2804_s16, 3 }
   0xf   : > { %p2908_p4 = por %p3507_p1, %p50_p0  ;;  %p2913_p6 = por %p227_p3, %p50_p0 }
  0x10   : > { %p2919_p9 = pnand %p2042_p5, %p276_p7  ;;  %s2806_s22 = smov [#allocation9]  }
  0x11   : > { %s3517_s19 = scalar_select %p2908_p4, 1, 0 }
  0x12   : > { %s3518_s20 = scalar_select %p2913_p6, 1, 0 }
  0x13   : > { %s3520_s21 = scalar_select %p2919_p9, 1, 0 }
  0x14   : > { %3519 = sst [smem:[#allocation24_spill]] %s3518_s20  ;;  %s288_s23 = sshll.u32 %s2806_s22, 4  ;;  %s2923_s23 = int_to_ptr.vmem [resolvable:$true] %s288_s23 }
  0x15   : > { %p2387_p10 = pneg %p2919_p9  ;;  %s2807_s25 = smov [#allocation11]  }
  0x16   : > { %s304_s26 = sshll.u32 %s2807_s25, 4  ;;  %s2808_s27 = smov [#allocation12]   ;;  %s2934_s26 = int_to_ptr.vmem [resolvable:$true] %s304_s26 }
  0x17   : > { %p2930_p12 = pnand %p2387_p10, %p3507_p1  ;;  %s2936_s28 = sshll.u32 %s2808_s27, 4  ;;  %s318_s28 = int_to_ptr.vmem [resolvable:$true] %s2936_s28 }
  0x18   : > { %s2560_s11 = scalar_lea.hbm %s3497_s1, 512 }
  0x19   : > { %p2561_p13 = scmp.ne.s32.totalorder %s3497_s1, %s2560_s11  ;;  %p2946_p0 = pneg %p2930_p12 }
  0x1a   : > { %p2567_p7 = scmp.lt.u32.totalorder %s2560_s11, %s3497_s1 }
  0x1b   : > { %p2563_p3 = pnand %p2946_p0, %p2561_p13 }
  0x1d   : > { %p2564_p5 = pneg %p2563_p3 }
  0x1f   : > { %p2569_p10 = pnand %p2567_p7, %p2564_p5 }
  0x21   : > { %2572 = shalt.err (!%p2569_p10)
}
  0x22   : > { %s2573_s29 = scalar_lea.vmem %s2923_s23, 512  ;;  %p2581_p2 = scmp.lt.s32.totalorder %s2923_s23, %s2923_s23 }
  0x23   : > { %p2574_p11 = scmp.ne.s32.totalorder %s2923_s23, %s2573_s29  ;;  %p2582_p6 = scmp.lt.s32.totalorder %s2573_s29, %s2573_s29 }
  0x25   : > { %p2576_p8 = pnand %p2574_p11, %p2946_p0  ;;  %p2583_p13 = por %p2582_p6, %p2581_p2 }
  0x27   : > { %p2577_p1 = pneg %p2576_p8 }
  0x29   : > { %p2584_p3 = pnand %p2583_p13, %p2577_p1 }
  0x2b   : > { %2587 = shalt.err (!%p2584_p3)
}
  0x2c   : > { %s2809_s30 = smov 128   ;;  %s2810_s11 = smov 8  }
  0x2d   : > { %2390 = dma.hbm_to_vmem [thread:$0]  (!%p2930_p12), %s3497_s1, 512, %s2923_s23, [#allocation10], %s2809_s30, %s2809_s30, %s2810_s11  }
  0x2e   : > { %s2588_s29 = scalar_lea.hbm %s3499_s3, 512 }
  0x2f   : > { %p2589_p1 = scmp.ne.s32.totalorder %s3499_s3, %s2588_s29  ;;  %p2595_p8 = scmp.lt.u32.totalorder %s2588_s29, %s3499_s3 }
  0x31   : > { %p2591_p2 = pnand %p2589_p1, %p2946_p0 }
  0x33   : > { %p2592_p6 = pneg %p2591_p2 }
  0x35   : > { %p2597_p11 = pnand %p2595_p8, %p2592_p6 }
  0x37   : > { %2600 = shalt.err (!%p2597_p11)
}
  0x38   : > { %s2601_s23 = scalar_lea.vmem %s2934_s26, 512  ;;  %p2609_p13 = scmp.lt.s32.totalorder %s2934_s26, %s2934_s26 }
  0x39   : > { %p2602_p5 = scmp.ne.s32.totalorder %s2934_s26, %s2601_s23  ;;  %p2610_p3 = scmp.lt.s32.totalorder %s2601_s23, %s2601_s23 }
  0x3b   : > { %p2604_p7 = pnand %p2602_p5, %p2946_p0  ;;  %p2611_p1 = por %p2610_p3, %p2609_p13 }
  0x3d   : > { %p2605_p10 = pneg %p2604_p7 }
  0x3f   : > { %p2612_p2 = pnand %p2611_p1, %p2605_p10 }
  0x41   : > { %2615 = shalt.err (!%p2612_p2)
}
  0x42   : > { %2393 = dma.hbm_to_vmem [thread:$0]  (!%p2930_p12), %s3499_s3, 512, %s2934_s26, [#allocation10], %s2809_s30, %s2809_s30, %s2810_s11  }
  0x43   : > { %s2616_s12 = scalar_lea.hbm %s3500_s4, 512 }
  0x44   : > { %p2617_p6 = scmp.ne.s32.totalorder %s3500_s4, %s2616_s12  ;;  %p2623_p5 = scmp.lt.u32.totalorder %s2616_s12, %s3500_s4 }
  0x46   : > { %p2619_p8 = pnand %p2617_p6, %p2946_p0 }
  0x48   : > { %p2620_p11 = pneg %p2619_p8 }
  0x4a   : > { %p2625_p7 = pnand %p2623_p5, %p2620_p11 }
  0x4c   : > { %2628 = shalt.err (!%p2625_p7)
}
  0x4d   : > { %s2629_s23 = scalar_lea.vmem %s318_s28, 512  ;;  %p2637_p1 = scmp.lt.s32.totalorder %s318_s28, %s318_s28 }
  0x4e   : > { %p2630_p10 = scmp.ne.s32.totalorder %s318_s28, %s2629_s23  ;;  %p2638_p2 = scmp.lt.s32.totalorder %s2629_s23, %s2629_s23 }
  0x50   : > { %p2632_p13 = pnand %p2630_p10, %p2946_p0  ;;  %p2639_p4 = por %p2638_p2, %p2637_p1 }
  0x52   : > { %p2633_p3 = pneg %p2632_p13 }
  0x54   : > { %p2640_p9 = pnand %p2639_p4, %p2633_p3 }
  0x56   : > { %2643 = shalt.err (!%p2640_p9)
}
  0x57   : > { %2396 = dma.hbm_to_vmem [thread:$0]  (!%p2930_p12), %s3500_s4, 512, %s318_s28, [#allocation13], %s2809_s30, %s2809_s30, %s2810_s11  }
  0x58   : > { %s3019_s22 = sadd.s32 1, %s2804_s16   ;;  %s37_s10 = sadd.s32 1, %s2800_s15 }
  0x59   : > { %s34_s24 = ssub.s32 %s2804_s16, %s3019_s22  ;;  %p44_p9 = scmp.ne.s32.totalorder %s2800_s15, %s2796_s14 }
  0x5a   : > { %p35_p4 = scmp.eq.s32.totalorder %s34_s24, 0  ;;  %p45_p0 = scmp.eq.s32.totalorder %s2804_s16, 0 }
  0x5b   : > { %p2408_p6 = scmp.lt.s32.totalorder %s2804_s16, 2  ;;  %p3523_p11 = scmp.eq.s32.totalorder %s2899_s17, 1 }
  0x5c   : > { %s3029_s13 = scalar_select %p35_p4, %s2800_s15, %s37_s10  }
  0x5d   : > { %p46_p8 = por %p45_p0, %p44_p9  ;;  %p3033_p5 = por %p3523_p11, %p44_p9 }
  0x5e   : > { %s340_s12 = sand.u32 1, %s2800_s15   ;;  %s2101_s18 = sshll.u32 %s2804_s16, 10 }
  0x5f   : > { %s2047_s28 = sshll.u32 %s340_s12, 6  ;;  %s3042_s29 = scalar_lea.hbm %s3496_s0, %s2101_s18 }
  0x60   : > { %s344_s23 = scalar_lea.vmem [#allocation6], %s2047_s28  ;;  %p3044_p12 = pnand %p2408_p6, %p46_p8 }
  0x61   : > { %s351_s26 = sshll.u32 %s344_s23, 4  ;;  %s3050_s24 = scalar_lea.sflag [#allocation7], %s340_s12  ;;  %s3048_s26 = int_to_ptr.vmem [resolvable:$true] %s351_s26 }
  0x62   : > { %s2644_s10 = scalar_lea.hbm %s3042_s29, 1024  ;;  %p2646_p10 = pneg %p3044_p12 }
  0x63   : > { %p2645_p7 = scmp.ne.s32.totalorder %s3042_s29, %s2644_s10  ;;  %s2649_s25 = scalar_lea.hbm %s3496_s0, 2048 }
  0x64   : > { %p2650_p1 = scmp.lt.u32.totalorder %s3042_s29, %s3496_s0  ;;  %p2651_p2 = scmp.lt.u32.totalorder %s2649_s25, %s2644_s10 }
  0x65   : > { %p2647_p13 = pnand %p2646_p10, %p2645_p7  ;;  %p2653_p9 = scmp.lt.u32.totalorder %s2644_s10, %s3042_s29 }
  0x66   : > { %p2652_p4 = por %p2651_p2, %p2650_p1 }
  0x67   : > { %p2648_p3 = pneg %p2647_p13 }
  0x68   : > { %p2654_p0 = por %p2653_p9, %p2652_p4 }
  0x6a   : > { %p2655_p6 = pnand %p2654_p0, %p2648_p3 }
  0x6c   : > { %2658 = shalt.err (!%p2655_p6)
}
  0x6d   : > { %s2659_s12 = scalar_lea.vmem %s3048_s26, 1024  ;;  %s2811_s18 = smov [#allocation6]  }
  0x6e   : > { %p2660_p8 = scmp.ne.s32.totalorder %s3048_s26, %s2659_s12  ;;  %s2664_s28 = sshll.u32 %s2811_s18, 4  ;;  %s2665_s28 = int_to_ptr.vmem [resolvable:$false] %s2664_s28 }
  0x6f   : > { %s2666_s27 = scalar_lea.vmem %s2665_s28, 2048  ;;  %p2667_p13 = scmp.lt.s32.totalorder %s3048_s26, %s2665_s28 }
  0x70   : > { %p2662_p11 = pnand %p2660_p8, %p2646_p10  ;;  %p2668_p1 = scmp.lt.s32.totalorder %s2666_s27, %s2659_s12 }
  0x72   : > { %p2663_p7 = pneg %p2662_p11  ;;  %p2669_p2 = por %p2668_p1, %p2667_p13 }
  0x74   : > { %p2670_p4 = pnand %p2669_p2, %p2663_p7 }
  0x76   : > { %2673 = shalt.err (!%p2670_p4)
}
  0x77   : > { %2400 = dma.hbm_to_vmem [thread:$0]  (!%p3044_p12), %s3042_s29, 1024, %s3048_s26, %s3050_s24, %s2809_s30, %s2809_s30, %s2810_s11  }
  0x78   : > { %p3526_p10 = scmp.ne.s32.totalorder %s3520_s21, 0 }
  0x79   : > { %s3084_s10 = sand.u32 (!%p3526_p10), 1, %s2796_s14   ;;  %p3527_p3 = scmp.ne.s32.totalorder (!%p3526_p10), %s3517_s19, 0 }
  0x7a   : > { %363 = sbr.rel (%p3526_p10) target bundleno = 6407 (0x1907), region = 52  ;;  %s2051_s25 = sshll.u32 (!%p3526_p10), %s3084_s10, 6 }
  0x7b   : > { %s366_s23 = scalar_lea.sflag (!%p3526_p10), [#allocation7], %s3084_s10  ;;  %s3088_s12 = scalar_lea.vmem (!%p3526_p10), [#allocation6], %s2051_s25 }
  0x81   : > { %2771 = dma.done.wait (%p3527_p3), %s366_s23, 1024  }
  0x82   : > { %2773 = vsyncadd (%p3527_p3), %s366_s23, 4294966272  ;;  %p3528_p12 = scmp.eq.s32.totalorder %s2899_s17, 0 }
  0x84   : > { %2775 = dma.done.wait (%p3528_p12), [#allocation10], 1024   ;;  %p3529_p9 = pmov %p3528_p12 }
  0x86   : > { %2777 = vsyncadd (%p3529_p9), [#allocation10], 4294966272  ;;  %p3530_p0 = pmov %p3529_p9 }
  0x88   : > { %2779 = dma.done.wait (%p3530_p0), [#allocation13], 512   ;;  %p3531_p6 = pmov %p3530_p0 }
  0x89   : > { %s3102_s21 = scalar_lea.vmem [#allocation14], %s2051_s25  ;;  %p3532_p8 = scmp.ne.s32.totalorder %s2899_s17, 0 }
  0x8a   : > { %2781 = vsyncadd (%p3531_p6), [#allocation13], 4294966784  ;;  %v424_v0 = vld [vmem:[%s3502_s6] sm:$0xff] (!%p3532_p8)  ;;  %vm425_vm0 = vcmask (!%p3532_p8), 261120  }
  0x8b   : > { %423 = sbr.rel (%p3532_p8) target bundleno = 146 (0x92), region = 72  ;;  %v427_v1 = vld [vmem:[%s3503_s7] sm:$0xff] (!%p3532_p8)  ;;  %426 = vst.msk [vmem:[#allocation2] sm:$0xff] (!%p3532_p8), %vm425_vm0, %v424_v0 }
  0x8c   : > { %428 = vst.msk [vmem:[#allocation3] sm:$0xff] (!%p3532_p8), %vm425_vm0, %v427_v1 }
  0x92 PF: > { %v437_v2 = vld [vmem:[#allocation9] sm:$0xff]  ;;  %v438_v3 = vld [vmem:[#allocation9 + $0x8] sm:$0xff]  ;;  %v439_v4 = vld [vmem:[#allocation9 + $0x10] sm:$0xff]  ;;  %vm448_vm1 = vcmask 261120   ;;  %v2812_v15 = vmov 0.0|0.0   ;;  %vm2813_vm2 = vmmov 0  }
  0x93   : > { %v2295_v5 = vpack.c.bf16 %v438_v3, %v437_v2  ;;  %v440_v6 = vld [vmem:[#allocation9 + $0x18] sm:$0xff]  ;;  %v433_v7 = vld [vmem:[%s3088_s12 + $0x20] sm:$0xff]  ;;  %v590_v11 = vld [vmem:[#allocation11 + $0x8] sm:$0xff]  ;;  %v2814_v21 = vmov 0.0   ;;  %s2815_s24 = smov 64   ;;  %s2816_s18 = smov 32  }
  0x94   : > { %v2299_v8 = vpack.c.bf16 %v440_v6, %v439_v4  ;;  %2181 = vmatprep.mubr.msk.f32.mxu1 %vm448_vm1, %v433_v7  ;;  %v429_v9 = vld [vmem:[%s3088_s12] sm:$0xff]  ;;  %v434_v12 = vld [vmem:[%s3088_s12 + $0x28] sm:$0xff]  ;;  %v435_v16 = vld [vmem:[%s3088_s12 + $0x30] sm:$0xff]  ;;  %s2817_s28 = smov 96   ;;  %s3170_s27 = sshll.u32 %s2899_s17, 3 }
  0x95   : > { %2359 = vmatprep.subr.bf16.mxu1 %v2295_v5  ;;  %2296 = vmatprep.subr.bf16.mxu0 %v2295_v5  ;;  %v589_v10 = vld [vmem:[#allocation11] sm:$0xff]  ;;  %v430_v14 = vld [vmem:[%s3088_s12 + $0x8] sm:$0xff]  ;;  %v591_v17 = vld [vmem:[#allocation11 + $0x10] sm:$0xff]  ;;  %p696_p11 = scmp.lt.s32.totalorder %s3170_s27, 9  ;;  %s826_s30 = sadd.s32 1, %s3170_s27 }
  0x96   : > { %2361 = vmatpush3.bf16.msra.mxu1 %v2295_v5  ;;  %2298 = vmatpush3.bf16.msra.mxu0 %v2295_v5  ;;  %v3117_v13 = vpack.c.bf16 %v590_v11, %v589_v10  ;;  %v592_v18 = vld [vmem:[#allocation11 + $0x18] sm:$0xff]  ;;  %v3137_v22 = vld [vmem:[#allocation2] sm:$0xff]  ;;  %p827_p7 = scmp.lt.s32.totalorder %s826_s30, 9  ;;  %s1090_s8 = sadd.s32 3, %s3170_s27 }
  0x97   : > { %2360 = vmatprep.subr.bf16.mxu1 %v2299_v8  ;;  %2300 = vmatprep.subr.bf16.mxu0 %v2299_v8  ;;  %v436_v19 = vld [vmem:[%s3088_s12 + $0x38] sm:$0xff]  ;;  %v3128_v20 = vpack.c.bf16 %v592_v18, %v591_v17  ;;  %v3157_v27 = vld [vmem:[%s3498_s2] ss:$0 sm:$0xff]  ;;  %s697_s25 = scalar_select %p696_p11, 1, 0 }
  0x98   : > { %2175 = vmatprep.mubr.msk.f32.mxu0 %vm448_vm1, %v429_v9  ;;  %v587_v35 = vld [vmem:[#allocation3] sm:$0xff]  ;;  %s828_s19 = scalar_select %p827_p7, 1, 0 }
  0x99   : > { %s698_s23 = scvt.s32.f32 %s697_s25  ;;  %v432_v17 = vld [vmem:[%s3088_s12 + $0x18] sm:$0xff]  ;;  %p1091_p1 = scmp.lt.s32.totalorder %s1090_s8, 9 }
  0x9a   : > { %2362 = vmatpush3.bf16.msra.mxu1 %v2299_v8  ;;  %2302 = vmatpush3.bf16.msra.mxu0 %v2299_v8  ;;  %s829_s11 = scvt.s32.f32 %s828_s19  ;;  %s1222_s30 = sadd.s32 4, %s3170_s27 }
  0x9b   : > { %2303 = vmatprep.subr.bf16.mxu1 %v2812_v15  ;;  %2315 = vmatprep.subr.bf16.mxu0 %v2812_v15  ;;  %v703_v46 = vstv %s698_s23  ;;  %s1092_s25 = scalar_select %p1091_p1, 1, 0 }
  0x9c   : > { %v834_v10 = vstv %s829_s11  ;;  %p1223_p2 = scmp.lt.s32.totalorder %s1222_s30, 9  ;;  %s1486_s8 = sadd.s32 6, %s3170_s27 }
  0x9d   : > { %2182 = vmatmul.mubr.msk.f32.vlgmr.msra.gmra.mrb[0].mxu1 %vm448_vm1, %v434_v12  ;;  %2176 = vmatmul.mubr.msk.f32.vlgmr.msra.gmra.mrb[0].mxu0 %vm448_vm1, %v430_v14  ;;  %s1093_s23 = scvt.s32.f32 %s1092_s25  ;;  %p1487_p10 = scmp.lt.s32.totalorder %s1486_s8, 9 }
  0x9e   : > { %2305 = vmatpush3.bf16.msra.mxu1 %v3117_v13  ;;  %2184 = vmatprep.mubr.msk.f32.mxu1 %vm448_vm1, %v435_v16  ;;  %v431_v16 = vld [vmem:[%s3088_s12 + $0x10] sm:$0xff]  ;;  %s958_s12 = sadd.s32 2, %s3170_s27  ;;  %p3533_p9 = scmp.eq.s32.totalorder %s2899_s17, 1 }
  0x9f   : > { %2306 = vmatprep.subr.bf16.mxu1 %v2812_v15  ;;  %2317 = vmatpush3.bf16.msra.mxu0 %v3117_v13  ;;  %p959_p13 = scmp.lt.s32.totalorder %s958_s12, 9  ;;  %s1354_s12 = sadd.s32 5, %s3170_s27 }
  0xa0   : > { %2318 = vmatprep.subr.bf16.mxu0 %v2812_v15  ;;  %2178 = vmatprep.mubr.msk.f32.mxu0 %vm448_vm1, %v431_v16  ;;  %s1224_s19 = scalar_select %p1223_p2, 1, 0 }
  0xa1   : > { %2185 = vmatmul.mubr.msk.f32.gmra.mrb[2].mxu1 %vm448_vm1, %v436_v19  ;;  %2179 = vmatmul.mubr.msk.f32.gmra.mrb[2].mxu0 %vm448_vm1, %v432_v17  ;;  %s960_s29 = scalar_select %p959_p13, 1, 0  ;;  %v1098_v17 = vstv %s1093_s23 }
  0xa2   : > { %2308 = vmatpush3.bf16.msra.mxu1 %v3128_v20  ;;  %2195 = vmatprep.mubr.msk.f32.mxu1 %vm2813_vm2, %v2814_v21  ;;  %s1225_s11 = scvt.s32.f32 %s1224_s19  ;;  %p1355_p4 = scmp.lt.s32.totalorder %s1354_s12, 9 }
  0xa3   : > { %2309 = vmatprep.subr.bf16.mxu1 %v2812_v15  ;;  %2320 = vmatpush3.bf16.msra.mxu0 %v3128_v20  ;;  %s961_s26 = scvt.s32.f32 %s960_s29 }
  0xa4   : > { %2327 = vmatprep.subr.bf16.mxu0 %v2812_v15  ;;  %2217 = vmatprep.mubr.msk.f32.mxu0 %vm2813_vm2, %v2814_v21  ;;  %s1356_s29 = scalar_select %p1355_p4, 1, 0 }
  0xa5   : > { %2196 = vmatmul.mubr.msk.f32.vlgmr.msra.gmra.mrb[4].mxu1 %vm448_vm1, %v3137_v22  ;;  %s1488_s25 = scalar_select %p1487_p10, 1, 0 }
  0xa6   : > { %2311 = vmatpush3.bf16.msra.mxu1 %v3117_v13  ;;  %2206 = vmatprep.mubr.msk.f32.mxu1 %vm2813_vm2, %v2814_v21 }
  0xa7   : > { %2312 = vmatprep.subr.bf16.mxu1 %v2812_v15  ;;  %s1489_s23 = scvt.s32.f32 %s1488_s25 }
  0xaa   : > { %2314 = vmatpush3.bf16.msra.mxu1 %v3128_v20 }
  0xab   : > { %2321 = vmatprep.subr.bf16.mxu1 %v2812_v15 }
 0x170   : > { %v3150_v23 = vpop.f32.mrb[0].mxu1  ;;  %v2177_v24 = vpop.f32.mrb[0].mxu0 }
 0x171   : > { %v3152_v25 = vpop.f32.mrb[1].mxu1  ;;  %v539_v26 = vpop.f32.mrb[1].mxu0  ;;  %v545_v59 = vadd.f32 %v2177_v24, %v3157_v27 }
 0x172   : > { %v540_v30 = vadd.f32 %v3157_v27, %v539_v26 }
 0x174   : > { %v3159_v28 = vpop.f32.mrb[2].mxu1 }
 0x175   : > { %v3161_v29 = vpop.f32.mrb[3].mxu1 }
 0x178   : > { %v662_v31 = vpop.f32.mrb[4].mxu1 }
 0x179   : > { %v666_v32 = vadd.f32 %v662_v31, %v540_v30  ;;  %v2197_v33 = vpop.f32.mrb[5].mxu1 }
 0x17b   : > { %2464 = vtanh.f32 %v666_v32  ;;  %v2067_v36 = vmul.f32 -1.442695, %v666_v32 }
 0x17d   : > { %2466 = vpow2.f32 %v2067_v36 }
 0x185   : > { %v2465_v34 = vpop.eup %2464 }
 0x186   : > { %680 = vrot.lane.b32.xlu0 %v2465_v34, %s2815_s24  ;;  %v2180_v34 = vpop.f32.mrb[2].mxu0 }
 0x187   : > { %v2467_v37 = vpop.eup %2466 }
 0x188   : > { %v670_v38 = vadd.f32 1.0, %v2467_v37 }
 0x18a   : > { %675 = vrot.lane.b32.xlu0 %v587_v35, %s2816_s18  ;;  %2468 = vrcp.f32 %v670_v38 }
 0x18e   : > { %699 = vrot.lane.b32.xlu0 %v3137_v22, %s2817_s28 }
 0x194   : > { %v2469_v39 = vpop.eup %2468 }
 0x1f8   : > { %v681_v40 = vpop.permute.xlu0 %680 }
 0x1f9   : > { %v683_v41 = vmul.f32 %v2469_v39, %v681_v40 }
 0x1fb   : > { %685 = vrot.lane.b32.xlu1 %v683_v41, %s2816_s18 }
 0x1fc   : > { %v676_v42 = vpop.permute.xlu0 %675 }
 0x1fd   : > { %v678_v43 = vmul.f32 %v2469_v39, %v676_v42 }
 0x200   : > { %v700_v50 = vpop.permute.xlu0 %699 }
 0x26d   : > { %v686_v44 = vpop.permute.xlu1 %685 }
 0x26e   : > { %v688_v45 = vadd.f32 %v686_v44, %v678_v43 }
 0x270   : > { %2470 = vtanh.f32 %v688_v45  ;;  %v710_v47 = vsub.f32 %v688_v45, %v676_v42 }
 0x272   : > { %v711_v48 = vmul.f32 %v710_v47, %v703_v46 }
 0x274   : > { %713 = vrot.lane.b32.xlu0 %v711_v48, %s2817_s28 }
 0x27a   : > { %v2471_v49 = vpop.eup %2470 }
 0x27b   : > { %691 = vrot.lane.b32.xlu1 %v2471_v49, %s2815_s24 }
 0x2e6   : > { %v714_v51 = vpop.permute.xlu0 %713 }
 0x2e7   : > { %v716_v52 = vadd.f32 %v714_v51, %v587_v35  ;;  %v549_v35 = vpop.f32.mrb[3].mxu0  ;;  %v966_v51 = vstv %s961_s26  ;;  %s1357_s26 = scvt.s32.f32 %s1356_s29 }
 0x2e8   : > { %v550_v36 = vadd.f32 %v3157_v27, %v549_v35 }
 0x2e9   : > { %806 = vrot.lane.b32.xlu0 %v716_v52, %s2816_s18 }
 0x2ed   : > { %v692_v53 = vpop.permute.xlu1 %691 }
 0x2ee   : > { %v694_v54 = vmul.f32 %v2469_v39, %v692_v53 }
 0x2f0   : > { %v702_v55 = vsub.f32 %v694_v54, %v700_v50 }
 0x2f2   : > { %v704_v56 = vmul.f32 %v703_v46, %v702_v55 }
 0x2f4   : > { %706 = vrot.lane.b32.xlu1 %v704_v56, %s2816_s18 }
 0x35b   : > { %v807_v6 = vpop.permute.xlu0 %806 }
 0x366   : > { %v707_v57 = vpop.permute.xlu1 %706 }
 0x367   : > { %v709_v58 = vadd.f32 %v707_v57, %v3137_v22 }
 0x369   : > { %717 = vst.msk [vmem:[#allocation5] sm:$0xff] %vm448_vm1, %v709_v58  ;;  %2207 = vmatmul.mubr.msk.f32.vlgmr.msra.gmra.mrb[6].mxu1 %vm448_vm1, %v709_v58 }
 0x36a   : > { %2323 = vmatpush3.bf16.msra.mxu1 %v3117_v13  ;;  %2228 = vmatprep.mubr.msk.f32.mxu1 %vm2813_vm2, %v2814_v21 }
 0x36b   : > { %2324 = vmatprep.subr.bf16.mxu1 %v2812_v15 }
 0x36e   : > { %2326 = vmatpush3.bf16.msra.mxu1 %v3128_v20 }
 0x36f   : > { %2333 = vmatprep.subr.bf16.mxu1 %v2812_v15 }
 0x43c   : > { %v793_v60 = vpop.f32.mrb[6].mxu1 }
 0x43d   : > { %v797_v61 = vadd.f32 %v793_v60, %v545_v59  ;;  %v2208_v62 = vpop.f32.mrb[7].mxu1 }
 0x43f   : > { %2472 = vtanh.f32 %v797_v61  ;;  %v2070_v0 = vmul.f32 -1.442695, %v797_v61 }
 0x441   : > { %2474 = vpow2.f32 %v2070_v0  ;;  %v555_v0 = vadd.f32 %v2180_v34, %v3157_v27 }
 0x449   : > { %v2473_v63 = vpop.eup %2472 }
 0x44a   : > { %811 = vrot.lane.b32.xlu1 %v2473_v63, %s2815_s24 }
 0x44b   : > { %v2475_v1 = vpop.eup %2474 }
 0x44c   : > { %v801_v2 = vadd.f32 1.0, %v2475_v1 }
 0x44e   : > { %2476 = vrcp.f32 %v801_v2 }
 0x458   : > { %v2477_v3 = vpop.eup %2476 }
 0x459   : > { %v809_v7 = vmul.f32 %v2477_v3, %v807_v6 }
 0x4bc   : > { %v812_v4 = vpop.permute.xlu1 %811 }
 0x4bd   : > { %v814_v5 = vmul.f32 %v2477_v3, %v812_v4 }
 0x4bf   : > { %816 = vrot.lane.b32.xlu1 %v814_v5, %s2816_s18 }
 0x4c3   : > { %830 = vrot.lane.b32.xlu1 %v709_v58, %s2817_s28 }
 0x531   : > { %v817_v8 = vpop.permute.xlu1 %816 }
 0x532   : > { %v819_v9 = vadd.f32 %v817_v8, %v809_v7 }
 0x534   : > { %2478 = vtanh.f32 %v819_v9  ;;  %v841_v11 = vsub.f32 %v819_v9, %v807_v6 }
 0x535   : > { %v831_v18 = vpop.permute.xlu1 %830 }
 0x536   : > { %v842_v12 = vmul.f32 %v841_v11, %v834_v10 }
 0x538   : > { %844 = vrot.lane.b32.xlu1 %v842_v12, %s2817_s28 }
 0x53e   : > { %v2479_v14 = vpop.eup %2478 }
 0x53f   : > { %822 = vrot.lane.b32.xlu0 %v2479_v14, %s2815_s24 }
 0x5aa   : > { %v845_v19 = vpop.permute.xlu1 %844 }
 0x5ab   : > { %v847_v22 = vadd.f32 %v845_v19, %v716_v52 }
 0x5ad   : > { %938 = vrot.lane.b32.xlu1 %v847_v22, %s2816_s18 }
 0x5b1   : > { %v823_v24 = vpop.permute.xlu0 %822 }
 0x5b2   : > { %v825_v26 = vmul.f32 %v2477_v3, %v823_v24 }
 0x5b4   : > { %v833_v30 = vsub.f32 %v825_v26, %v831_v18 }
 0x5b6   : > { %v835_v31 = vmul.f32 %v834_v10, %v833_v30 }
 0x5b8   : > { %837 = vrot.lane.b32.xlu0 %v835_v31, %s2816_s18 }
 0x61f   : > { %v939_v47 = vpop.permute.xlu1 %938 }
 0x62a   : > { %v838_v32 = vpop.permute.xlu0 %837 }
 0x62b   : > { %v840_v33 = vadd.f32 %v838_v32, %v709_v58 }
 0x62d   : > { %849 = vst.msk [vmem:[#allocation5 + $0x8] sm:$0xff] %vm448_vm1, %v840_v33  ;;  %2218 = vmatmul.mubr.msk.f32.vlgmr.msra.gmra.mrb[4].mxu0 %vm448_vm1, %v840_v33 }
 0x62e   : > { %2329 = vmatpush3.bf16.msra.mxu0 %v3117_v13  ;;  %2239 = vmatprep.mubr.msk.f32.mxu0 %vm2813_vm2, %v2814_v21 }
 0x62f   : > { %2330 = vmatprep.subr.bf16.mxu0 %v2812_v15 }
 0x632   : > { %2332 = vmatpush3.bf16.msra.mxu0 %v3128_v20 }
 0x633   : > { %2339 = vmatprep.subr.bf16.mxu0 %v2812_v15 }
 0x700   : > { %v925_v37 = vpop.f32.mrb[4].mxu0 }
 0x701   : > { %v929_v38 = vadd.f32 %v925_v37, %v550_v36  ;;  %v2219_v39 = vpop.f32.mrb[5].mxu0  ;;  %v560_v37 = vadd.f32 %v3157_v27, %v3152_v25 }
 0x703   : > { %2480 = vtanh.f32 %v929_v38  ;;  %v2072_v41 = vmul.f32 -1.442695, %v929_v38 }
 0x705   : > { %2482 = vpow2.f32 %v2072_v41 }
 0x70d   : > { %v2481_v40 = vpop.eup %2480 }
 0x70e   : > { %943 = vrot.lane.b32.xlu0 %v2481_v40, %s2815_s24 }
 0x70f   : > { %v2483_v42 = vpop.eup %2482 }
 0x710   : > { %v933_v43 = vadd.f32 1.0, %v2483_v42 }
 0x712   : > { %2484 = vrcp.f32 %v933_v43 }
 0x71c   : > { %v2485_v44 = vpop.eup %2484 }
 0x71d   : > { %v941_v48 = vmul.f32 %v2485_v44, %v939_v47 }
 0x780   : > { %v944_v45 = vpop.permute.xlu0 %943 }
 0x781   : > { %v946_v46 = vmul.f32 %v2485_v44, %v944_v45 }
 0x783   : > { %948 = vrot.lane.b32.xlu0 %v946_v46, %s2816_s18 }
 0x787   : > { %962 = vrot.lane.b32.xlu0 %v840_v33, %s2817_s28 }
 0x7f5   : > { %v949_v49 = vpop.permute.xlu0 %948 }
 0x7f6   : > { %v951_v50 = vadd.f32 %v949_v49, %v941_v48 }
 0x7f8   : > { %2486 = vtanh.f32 %v951_v50  ;;  %v973_v52 = vsub.f32 %v951_v50, %v939_v47 }
 0x7f9   : > { %v963_v55 = vpop.permute.xlu0 %962 }
 0x7fa   : > { %v974_v53 = vmul.f32 %v973_v52, %v966_v51 }
 0x7fc   : > { %976 = vrot.lane.b32.xlu0 %v974_v53, %s2817_s28 }
 0x802   : > { %v2487_v54 = vpop.eup %2486 }
 0x803   : > { %954 = vrot.lane.b32.xlu1 %v2487_v54, %s2815_s24 }
 0x86e   : > { %v977_v56 = vpop.permute.xlu0 %976 }
 0x86f   : > { %v979_v57 = vadd.f32 %v977_v56, %v847_v22 }
 0x871   : > { %1070 = vrot.lane.b32.xlu0 %v979_v57, %s2816_s18 }
 0x875   : > { %v955_v58 = vpop.permute.xlu1 %954 }
 0x876   : > { %v957_v59 = vmul.f32 %v2485_v44, %v955_v58 }
 0x878   : > { %v965_v60 = vsub.f32 %v957_v59, %v963_v55 }
 0x87a   : > { %v967_v61 = vmul.f32 %v966_v51, %v965_v60  ;;  %v1230_v51 = vstv %s1225_s11  ;;  %s1618_s11 = sadd.s32 7, %s3170_s27 }
 0x87b   : > { %p1619_p3 = scmp.lt.s32.totalorder %s1618_s11, 9 }
 0x87c   : > { %969 = vrot.lane.b32.xlu1 %v967_v61, %s2816_s18 }
 0x87d   : > { %s1620_s12 = scalar_select %p1619_p3, 1, 0 }
 0x87f   : > { %s3339_s29 = scvt.s32.f32 %s1620_s12 }
 0x8e3   : > { %v1071_v11 = vpop.permute.xlu0 %1070 }
 0x8ee   : > { %v970_v62 = vpop.permute.xlu1 %969 }
 0x8ef   : > { %v972_v63 = vadd.f32 %v970_v62, %v840_v33 }
 0x8f1   : > { %981 = vst.msk [vmem:[#allocation5 + $0x10] sm:$0xff] %vm448_vm1, %v972_v63  ;;  %2229 = vmatmul.mubr.msk.f32.vlgmr.msra.gmra.mrb[8].mxu1 %vm448_vm1, %v972_v63 }
 0x8f2   : > { %2335 = vmatpush3.bf16.msra.mxu1 %v3117_v13  ;;  %2250 = vmatprep.mubr.msk.f32.mxu1 %vm2813_vm2, %v2814_v21 }
 0x8f3   : > { %2336 = vmatprep.subr.bf16.mxu1 %v2812_v15 }
 0x8f6   : > { %2338 = vmatpush3.bf16.msra.mxu1 %v3128_v20 }
 0x8f7   : > { %2345 = vmatprep.subr.bf16.mxu1 %v2812_v15 }
 0x9c4   : > { %v1057_v1 = vpop.f32.mrb[8].mxu1 }
 0x9c5   : > { %v1061_v2 = vadd.f32 %v1057_v1, %v555_v0  ;;  %v2230_v3 = vpop.f32.mrb[9].mxu1  ;;  %v565_v0 = vadd.f32 %v3150_v23, %v3157_v27 }
 0x9c7   : > { %2488 = vtanh.f32 %v1061_v2  ;;  %v2074_v5 = vmul.f32 -1.442695, %v1061_v2 }
 0x9c9   : > { %2490 = vpow2.f32 %v2074_v5 }
 0x9d1   : > { %v2489_v4 = vpop.eup %2488 }
 0x9d2   : > { %1075 = vrot.lane.b32.xlu1 %v2489_v4, %s2815_s24 }
 0x9d3   : > { %v2491_v6 = vpop.eup %2490 }
 0x9d4   : > { %v1065_v7 = vadd.f32 1.0, %v2491_v6 }
 0x9d6   : > { %2492 = vrcp.f32 %v1065_v7 }
 0x9e0   : > { %v2493_v8 = vpop.eup %2492 }
 0x9e1   : > { %v1073_v12 = vmul.f32 %v2493_v8, %v1071_v11 }
 0xa44   : > { %v1076_v9 = vpop.permute.xlu1 %1075 }
 0xa45   : > { %v1078_v10 = vmul.f32 %v2493_v8, %v1076_v9 }
 0xa47   : > { %1080 = vrot.lane.b32.xlu1 %v1078_v10, %s2816_s18  ;;  %v1362_v10 = vstv %s1357_s26 }
 0xa4b   : > { %1094 = vrot.lane.b32.xlu1 %v972_v63, %s2817_s28 }
 0xab9   : > { %v1081_v14 = vpop.permute.xlu1 %1080 }
 0xaba   : > { %v1083_v16 = vadd.f32 %v1081_v14, %v1073_v12 }
 0xabc   : > { %2494 = vtanh.f32 %v1083_v16  ;;  %v1105_v18 = vsub.f32 %v1083_v16, %v1071_v11 }
 0xabd   : > { %v1095_v24 = vpop.permute.xlu1 %1094 }
 0xabe   : > { %v1106_v19 = vmul.f32 %v1105_v18, %v1098_v17  ;;  %v1655_v18 = vld [vmem:[#allocation12 + $0x8] sm:$0xff] }
 0xac0   : > { %1108 = vrot.lane.b32.xlu1 %v1106_v19, %s2817_s28 }
 0xac6   : > { %v2495_v22 = vpop.eup %2494 }
 0xac7   : > { %1086 = vrot.lane.b32.xlu0 %v2495_v22, %s2815_s24 }
 0xb32   : > { %v1109_v26 = vpop.permute.xlu1 %1108 }
 0xb33   : > { %v1111_v30 = vadd.f32 %v1109_v26, %v979_v57 }
 0xb35   : > { %1202 = vrot.lane.b32.xlu1 %v1111_v30, %s2816_s18 }
 0xb39   : > { %v1087_v31 = vpop.permute.xlu0 %1086 }
 0xb3a   : > { %v1089_v32 = vmul.f32 %v2493_v8, %v1087_v31 }
 0xb3c   : > { %v1097_v33 = vsub.f32 %v1089_v32, %v1095_v24 }
 0xb3e   : > { %v1099_v34 = vmul.f32 %v1098_v17, %v1097_v33  ;;  %v1654_v17 = vld [vmem:[#allocation12] sm:$0xff]  ;;  %v1656_v33 = vld [vmem:[#allocation12 + $0x10] sm:$0xff] }
 0xb3f   : > { %v2351_v22 = vpack.c.bf16 %v1655_v18, %v1654_v17 }
 0xb40   : > { %1101 = vrot.lane.b32.xlu0 %v1099_v34, %s2816_s18  ;;  %v1657_v34 = vld [vmem:[#allocation12 + $0x18] sm:$0xff] }
 0xba7   : > { %v1203_v25 = vpop.permute.xlu1 %1202 }
 0xbb2   : > { %v1102_v35 = vpop.permute.xlu0 %1101 }
 0xbb3   : > { %v1104_v36 = vadd.f32 %v1102_v35, %v972_v63 }
 0xbb5   : > { %1113 = vst.msk [vmem:[#allocation5 + $0x18] sm:$0xff] %vm448_vm1, %v1104_v36  ;;  %2240 = vmatmul.mubr.msk.f32.vlgmr.msra.gmra.mrb[6].mxu0 %vm448_vm1, %v1104_v36 }
 0xbb6   : > { %2341 = vmatpush3.bf16.msra.mxu0 %v3117_v13  ;;  %2261 = vmatprep.mubr.msk.f32.mxu0 %vm2813_vm2, %v2814_v21 }
 0xbb7   : > { %2342 = vmatprep.subr.bf16.mxu0 %v2812_v15 }
 0xbba   : > { %2344 = vmatpush3.bf16.msra.mxu0 %v3128_v20 }
 0xbbb   : > { %2352 = vmatprep.subr.bf16.mxu0 %v2351_v22 }
 0xc88   : > { %v1189_v38 = vpop.f32.mrb[6].mxu0 }
 0xc89   : > { %v1193_v39 = vadd.f32 %v1189_v38, %v560_v37  ;;  %v2241_v40 = vpop.f32.mrb[7].mxu0  ;;  %v2355_v37 = vpack.c.bf16 %v1657_v34, %v1656_v33  ;;  %v1646_v38 = vld [vmem:[#allocation5] sm:$0xff] }
 0xc8a   : > { %v1648_v40 = vld [vmem:[#allocation5 + $0x10] sm:$0xff] }
 0xc8b   : > { %2496 = vtanh.f32 %v1193_v39  ;;  %v2076_v42 = vmul.f32 -1.442695, %v1193_v39  ;;  %v1647_v39 = vld [vmem:[#allocation5 + $0x8] sm:$0xff] }
 0xc8d   : > { %2498 = vpow2.f32 %v2076_v42 }
 0xc95   : > { %v2497_v41 = vpop.eup %2496 }
 0xc96   : > { %1207 = vrot.lane.b32.xlu0 %v2497_v41, %s2815_s24  ;;  %v1649_v41 = vld [vmem:[#allocation5 + $0x18] sm:$0xff] }
 0xc97   : > { %v2499_v43 = vpop.eup %2498 }
 0xc98   : > { %v1197_v44 = vadd.f32 1.0, %v2499_v43 }
 0xc9a   : > { %2500 = vrcp.f32 %v1197_v44  ;;  %v570_v44 = vadd.f32 %v3157_v27, %v3161_v29 }
 0xca4   : > { %v2501_v45 = vpop.eup %2500 }
 0xca5   : > { %v1205_v48 = vmul.f32 %v2501_v45, %v1203_v25 }
 0xd08   : > { %v1208_v46 = vpop.permute.xlu0 %1207 }
 0xd09   : > { %v1210_v47 = vmul.f32 %v2501_v45, %v1208_v46 }
 0xd0b   : > { %1212 = vrot.lane.b32.xlu0 %v1210_v47, %s2816_s18 }
 0xd0f   : > { %1226 = vrot.lane.b32.xlu0 %v1104_v36, %s2817_s28 }
 0xd7d   : > { %v1213_v49 = vpop.permute.xlu0 %1212 }
 0xd7e   : > { %v1215_v50 = vadd.f32 %v1213_v49, %v1205_v48 }
 0xd80   : > { %2502 = vtanh.f32 %v1215_v50  ;;  %v1237_v52 = vsub.f32 %v1215_v50, %v1203_v25 }
 0xd81   : > { %v1227_v55 = vpop.permute.xlu0 %1226 }
 0xd82   : > { %v1238_v53 = vmul.f32 %v1237_v52, %v1230_v51 }
 0xd84   : > { %1240 = vrot.lane.b32.xlu0 %v1238_v53, %s2817_s28 }
 0xd8a   : > { %v2503_v54 = vpop.eup %2502 }
 0xd8b   : > { %1218 = vrot.lane.b32.xlu1 %v2503_v54, %s2815_s24 }
 0xdf6   : > { %v1241_v56 = vpop.permute.xlu0 %1240 }
 0xdf7   : > { %v1243_v57 = vadd.f32 %v1241_v56, %v1111_v30 }
 0xdf9   : > { %1334 = vrot.lane.b32.xlu0 %v1243_v57, %s2816_s18 }
 0xdfd   : > { %v1219_v58 = vpop.permute.xlu1 %1218 }
 0xdfe   : > { %v1221_v59 = vmul.f32 %v2501_v45, %v1219_v58 }
 0xe00   : > { %v1229_v60 = vsub.f32 %v1221_v59, %v1227_v55 }
 0xe02   : > { %v1231_v61 = vmul.f32 %v1230_v51, %v1229_v60 }
 0xe04   : > { %1233 = vrot.lane.b32.xlu1 %v1231_v61, %s2816_s18 }
 0xe76   : > { %v1234_v62 = vpop.permute.xlu1 %1233 }
 0xe77   : > { %v1236_v63 = vadd.f32 %v1234_v62, %v1104_v36 }
 0xe79   : > { %1245 = vst.msk [vmem:[#allocation5 + $0x20] sm:$0xff] %vm448_vm1, %v1236_v63  ;;  %2251 = vmatmul.mubr.msk.f32.vlgmr.msra.gmra.mrb[10].mxu1 %vm448_vm1, %v1236_v63 }
 0xe7a   : > { %2347 = vmatpush3.bf16.msra.mxu1 %v3117_v13  ;;  %2272 = vmatprep.mubr.msk.f32.mxu1 %vm2813_vm2, %v2814_v21 }
 0xe7b   : > { %2348 = vmatprep.subr.bf16.mxu1 %v2812_v15 }
 0xe7e   : > { %2350 = vmatpush3.bf16.msra.mxu1 %v3128_v20  ;;  %v1335_v20 = vpop.permute.xlu0 %1334 }
 0xe80   : > { %v1650_v42 = vld [vmem:[#allocation5 + $0x20] sm:$0xff] }
 0xf4c   : > { %v1321_v1 = vpop.f32.mrb[10].mxu1 }
 0xf4d   : > { %v1325_v2 = vadd.f32 %v1321_v1, %v565_v0  ;;  %v2252_v3 = vpop.f32.mrb[11].mxu1 }
 0xf4f   : > { %2504 = vtanh.f32 %v1325_v2  ;;  %v2078_v5 = vmul.f32 -1.442695, %v1325_v2 }
 0xf51   : > { %2506 = vpow2.f32 %v2078_v5 }
 0xf59   : > { %v2505_v4 = vpop.eup %2504 }
 0xf5a   : > { %1339 = vrot.lane.b32.xlu1 %v2505_v4, %s2815_s24 }
 0xf5b   : > { %v2507_v13 = vpop.eup %2506 }
 0xf5c   : > { %v1329_v6 = vadd.f32 1.0, %v2507_v13 }
 0xf5e   : > { %2508 = vrcp.f32 %v1329_v6 }
 0xf68   : > { %v2509_v21 = vpop.eup %2508 }
 0xf69   : > { %v1337_v23 = vmul.f32 %v2509_v21, %v1335_v20 }
 0xfcc   : > { %v1340_v15 = vpop.permute.xlu1 %1339 }
 0xfcd   : > { %v1342_v7 = vmul.f32 %v2509_v21, %v1340_v15 }
 0xfcf   : > { %1344 = vrot.lane.b32.xlu1 %v1342_v7, %s2816_s18 }
 0xfd3   : > { %1358 = vrot.lane.b32.xlu1 %v1236_v63, %s2817_s28 }
0x1041   : > { %v1345_v8 = vpop.permute.xlu1 %1344 }
0x1042   : > { %v1347_v9 = vadd.f32 %v1345_v8, %v1337_v23  ;;  %v575_v8 = vadd.f32 %v3159_v28, %v3157_v27  ;;  %v3323_v27 = vld [vmem:[%s3501_s5] ss:$0 sm:$0xff] }
0x1044   : > { %2510 = vtanh.f32 %v1347_v9  ;;  %v1369_v11 = vsub.f32 %v1347_v9, %v1335_v20 }
0x1045   : > { %v1359_v16 = vpop.permute.xlu1 %1358 }
0x1046   : > { %v1370_v12 = vmul.f32 %v1369_v11, %v1362_v10 }
0x1048   : > { %1372 = vrot.lane.b32.xlu1 %v1370_v12, %s2817_s28 }
0x104e   : > { %v2511_v14 = vpop.eup %2510 }
0x104f   : > { %1350 = vrot.lane.b32.xlu0 %v2511_v14, %s2815_s24 }
0x10ba   : > { %v1373_v19 = vpop.permute.xlu1 %1372 }
0x10bb   : > { %v3267_v24 = vadd.f32 %v1373_v19, %v1243_v57 }
0x10bd   : > { %1466 = vrot.lane.b32.xlu1 %v3267_v24, %s2816_s18 }
0x10c1   : > { %v1351_v26 = vpop.permute.xlu0 %1350 }
0x10c2   : > { %v1353_v30 = vmul.f32 %v2509_v21, %v1351_v26 }
0x10c4   : > { %v1361_v31 = vsub.f32 %v1353_v30, %v1359_v16 }
0x10c6   : > { %v1363_v32 = vmul.f32 %v1362_v10, %v1361_v31 }
0x10c8   : > { %1365 = vrot.lane.b32.xlu0 %v1363_v32, %s2816_s18 }
0x112f   : > { %v1467_v59 = vpop.permute.xlu1 %1466 }
0x113a   : > { %v1366_v35 = vpop.permute.xlu0 %1365 }
0x113b   : > { %v3272_v36 = vadd.f32 %v1366_v35, %v1236_v63  ;;  %v1494_v63 = vstv %s1489_s23 }
0x113d   : > { %1377 = vst.msk [vmem:[#allocation5 + $0x28] sm:$0xff] %vm448_vm1, %v3272_v36  ;;  %2262 = vmatmul.mubr.msk.f32.vlgmr.msra.gmra.mrb[8].mxu0 %vm448_vm1, %v3272_v36 }
0x113e   : > { %2354 = vmatpush3.bf16.msra.mxu0 %v2351_v22  ;;  %2283 = vmatprep.mubr.msk.f32.mxu0 %vm448_vm1, %v1646_v38 }
0x113f   : > { %2356 = vmatprep.subr.bf16.mxu0 %v2355_v37 }
0x1142   : > { %2358 = vmatpush3.bf16.msra.mxu0 %v2355_v37 }
0x1144   : > { %v1651_v43 = vld [vmem:[#allocation5 + $0x28] sm:$0xff] }
0x1145   : > { %2284 = vmatmul.mubr.msk.f32.vlgmr.msra.gmra.mrb[10].mxu0 %vm448_vm1, %v1647_v39  ;;  %v1626_v39 = vstv %s3339_s29 }
0x1146   : > { %2286 = vmatprep.mubr.msk.f32.mxu0 %vm448_vm1, %v1648_v40 }
0x1149   : > { %2287 = vmatmul.mubr.msk.f32.gmra.mrb[12].mxu0 %vm448_vm1, %v1649_v41 }
0x114a   : > { %2289 = vmatprep.mubr.msk.f32.mxu0 %vm448_vm1, %v1650_v42 }
0x114d   : > { %2290 = vmatmul.mubr.msk.f32.gmra.mrb[14].mxu0 %vm448_vm1, %v1651_v43 }
0x1210   : > { %v1453_v45 = vpop.f32.mrb[8].mxu0 }
0x1211   : > { %v1457_v46 = vadd.f32 %v1453_v45, %v570_v44  ;;  %v2263_v47 = vpop.f32.mrb[9].mxu0 }
0x1213   : > { %2512 = vtanh.f32 %v1457_v46  ;;  %v2080_v29 = vmul.f32 -1.442695, %v1457_v46 }
0x1215   : > { %2514 = vpow2.f32 %v2080_v29 }
0x1218   : > { %v3286_v25 = vpop.f32.mrb[10].mxu0 }
0x1219   : > { %v3288_v48 = vpop.f32.mrb[11].mxu0  ;;  %v1761_v41 = vadd.f32 %v3286_v25, %v3323_v27 }
0x121a   : > { %v1756_v28 = vadd.f32 %v3323_v27, %v3288_v48 }
0x121c   : > { %v3290_v49 = vpop.f32.mrb[12].mxu0 }
0x121d   : > { %v2513_v50 = vpop.eup %2512  ;;  %v3292_v51 = vpop.f32.mrb[13].mxu0 }
0x121e   : > { %1471 = vrot.lane.b32.xlu0 %v2513_v50, %s2815_s24  ;;  %v1766_v42 = vadd.f32 %v3323_v27, %v3292_v51 }
0x121f   : > { %v2515_v54 = vpop.eup %2514 }
0x1220   : > { %v3295_v52 = vpop.f32.mrb[14].mxu0  ;;  %v1461_v55 = vadd.f32 1.0, %v2515_v54 }
0x1221   : > { %v3297_v53 = vpop.f32.mrb[15].mxu0  ;;  %v1781_v26 = vadd.f32 %v3295_v52, %v3323_v27 }
0x1222   : > { %2516 = vrcp.f32 %v1461_v55  ;;  %v1776_v43 = vadd.f32 %v3323_v27, %v3297_v53 }
0x122c   : > { %v2517_v56 = vpop.eup %2516 }
0x122d   : > { %v1469_v60 = vmul.f32 %v2517_v56, %v1467_v59 }
0x1290   : > { %v1472_v57 = vpop.permute.xlu0 %1471 }
0x1291   : > { %v1474_v58 = vmul.f32 %v2517_v56, %v1472_v57 }
0x1293   : > { %1476 = vrot.lane.b32.xlu0 %v1474_v58, %s2816_s18 }
0x1297   : > { %1490 = vrot.lane.b32.xlu0 %v3272_v36, %s2817_s28 }
0x1305   : > { %v1477_v61 = vpop.permute.xlu0 %1476 }
0x1306   : > { %v1479_v62 = vadd.f32 %v1477_v61, %v1469_v60 }
0x1308   : > { %2518 = vtanh.f32 %v1479_v62  ;;  %v1501_v0 = vsub.f32 %v1479_v62, %v1467_v59 }
0x1309   : > { %v1491_v3 = vpop.permute.xlu0 %1490 }
0x130a   : > { %v1502_v1 = vmul.f32 %v1501_v0, %v1494_v63 }
0x130c   : > { %1504 = vrot.lane.b32.xlu0 %v1502_v1, %s2817_s28 }
0x1312   : > { %v2519_v2 = vpop.eup %2518 }
0x1313   : > { %1482 = vrot.lane.b32.xlu1 %v2519_v2, %s2815_s24 }
0x137e   : > { %v1505_v4 = vpop.permute.xlu0 %1504 }
0x137f   : > { %v3306_v5 = vadd.f32 %v1505_v4, %v3267_v24  ;;  %v1771_v24 = vadd.f32 %v3290_v49, %v3323_v27 }
0x1381   : > { %1598 = vrot.lane.b32.xlu0 %v3306_v5, %s2816_s18 }
0x1385   : > { %v1483_v13 = vpop.permute.xlu1 %1482 }
0x1386   : > { %v1485_v6 = vmul.f32 %v2517_v56, %v1483_v13 }
0x1388   : > { %v1493_v21 = vsub.f32 %v1485_v6, %v1491_v3 }
0x138a   : > { %v1495_v15 = vmul.f32 %v1494_v63, %v1493_v21 }
0x138c   : > { %1497 = vrot.lane.b32.xlu1 %v1495_v15, %s2816_s18 }
0x13f3   : > { %v3331_v30 = vpop.permute.xlu0 %1598 }
0x13fe   : > { %v1498_v7 = vpop.permute.xlu1 %1497 }
0x13ff   : > { %v1500_v20 = vadd.f32 %v1498_v7, %v3272_v36 }
0x1401   : > { %1509 = vst.msk [vmem:[#allocation5 + $0x30] sm:$0xff] %vm448_vm1, %v1500_v20  ;;  %2273 = vmatmul.mubr.msk.f32.vlgmr.msra.gmra.mrb[12].mxu1 %vm448_vm1, %v1500_v20 }
0x1408   : > { %v1652_v23 = vld [vmem:[#allocation5 + $0x30] sm:$0xff] }
0x1409   : > { %2292 = vmatprep.mubr.msk.f32.mxu0 %vm448_vm1, %v1652_v23 }
0x14d4   : > { %v1585_v9 = vpop.f32.mrb[12].mxu1 }
0x14d5   : > { %v1589_v10 = vadd.f32 %v1585_v9, %v575_v8  ;;  %v2274_v11 = vpop.f32.mrb[13].mxu1 }
0x14d7   : > { %2520 = vtanh.f32 %v1589_v10  ;;  %v2082_v14 = vmul.f32 -1.442695, %v1589_v10 }
0x14d9   : > { %2522 = vpow2.f32 %v2082_v14 }
0x14e1   : > { %v2521_v12 = vpop.eup %2520 }
0x14e2   : > { %1603 = vrot.lane.b32.xlu1 %v2521_v12, %s2815_s24 }
0x14e3   : > { %v2523_v16 = vpop.eup %2522 }
0x14e4   : > { %v1593_v17 = vadd.f32 1.0, %v2523_v16 }
0x14e6   : > { %2524 = vrcp.f32 %v1593_v17 }
0x14f0   : > { %v2525_v18 = vpop.eup %2524 }
0x14f1   : > { %v1601_v31 = vmul.f32 %v2525_v18, %v3331_v30 }
0x1554   : > { %v1604_v19 = vpop.permute.xlu1 %1603 }
0x1555   : > { %v1606_v22 = vmul.f32 %v2525_v18, %v1604_v19 }
0x1557   : > { %1608 = vrot.lane.b32.xlu1 %v1606_v22, %s2816_s18 }
0x155b   : > { %1622 = vrot.lane.b32.xlu1 %v1500_v20, %s2817_s28 }
0x157f   : > { %1794 = vmax.xlane.f32.xlu1 %v1756_v28 }
0x1583   : > { %1800 = vmax.xlane.f32.xlu1 %v1771_v24 }
0x1587   : > { %1804 = vmax.xlane.f32.xlu1 %v1781_v26 }
0x15c9   : > { %v1609_v32 = vpop.permute.xlu1 %1608 }
0x15ca   : > { %v3334_v33 = vadd.f32 %v1609_v32, %v1601_v31 }
0x15cc   : > { %2526 = vtanh.f32 %v3334_v33 }
0x15cd   : > { %v1623_v37 = vpop.permute.xlu1 %1622 }
0x15d6   : > { %v2527_v34 = vpop.eup %2526 }
0x15d7   : > { %1614 = vrot.lane.b32.xlu0 %v2527_v34, %s2815_s24  ;;  %s2818_s24 = smov [#allocation15]  }
0x160c   : > { %v1795_v47 = vpop.xlane.xlu1 %1794 }
0x160d   : > { %v3357_v51 = vsub.f32 %v1756_v28, %v1795_v47  ;;  %v1633_v47 = vsub.f32 %v3334_v33, %v3331_v30 }
0x160f   : > { %v1818_v29 = vmul.f32 1.442695, %v3357_v51 }
0x1610   : > { %v1801_v48 = vpop.xlane.xlu1 %1800 }
0x1611   : > { %v3359_v52 = vsub.f32 %v1771_v24, %v1801_v48 }
0x1613   : > { %v1824_v57 = vmul.f32 1.442695, %v3359_v52 }
0x1614   : > { %v1805_v54 = vpop.xlane.xlu1 %1804 }
0x1615   : > { %v3366_v58 = vsub.f32 %v1781_v26, %v1805_v54 }
0x1617   : > { %v1828_v61 = vmul.f32 1.442695, %v3366_v58 }
0x1649   : > { %v1615_v35 = vpop.permute.xlu0 %1614 }
0x164a   : > { %v1617_v36 = vmul.f32 %v2525_v18, %v1615_v35 }
0x164c   : > { %v1625_v38 = vsub.f32 %v1617_v36, %v1623_v37 }
0x164e   : > { %v1627_v40 = vmul.f32 %v1626_v39, %v1625_v38 }
0x1650   : > { %1629 = vrot.lane.b32.xlu0 %v1627_v40, %s2816_s18  ;;  %s1910_s18 = sshll.u32 %s2818_s24, 4  ;;  %s1911_s18 = int_to_ptr.vmem [resolvable:$true] %s1910_s18 }
0x1651   : > { %s2674_s27 = scalar_lea.vmem %s1911_s18, 128  ;;  %p2681_p8 = scmp.lt.s32.totalorder %s1911_s18, %s1911_s18 }
0x1652   : > { %p2675_p12 = scmp.ne.s32.totalorder %s1911_s18, %s2674_s27  ;;  %p2682_p11 = scmp.lt.s32.totalorder %s2674_s27, %s2674_s27 }
0x1654   : > { %p2676_p0 = pnand %p2675_p12, %p3533_p9  ;;  %p2683_p7 = por %p2682_p11, %p2681_p8 }
0x1656   : > { %p2677_p6 = pneg %p2676_p0 }
0x1658   : > { %p2684_p13 = pnand %p2683_p7, %p2677_p6 }
0x166f   : > { %1796 = vmax.xlane.f32.xlu0 %v1761_v41 }
0x1673   : > { %1798 = vmax.xlane.f32.xlu0 %v1766_v42 }
0x1677   : > { %1802 = vmax.xlane.f32.xlu0 %v1776_v43 }
0x16c2   : > { %v1630_v44 = vpop.permute.xlu0 %1629 }
0x16c3   : > { %v1632_v45 = vadd.f32 %v1630_v44, %v1500_v20 }
0x16c5   : > { %1641 = vst.msk [vmem:[#allocation5 + $0x38] sm:$0xff] %vm448_vm1, %v1632_v45  ;;  %1642 = vst.msk [vmem:[#allocation2] sm:$0xff] %vm448_vm1, %v1632_v45 }
0x16c6   : > { %1644 = vst.msk [vmem:[#allocation15] sm:$0xff] %vm448_vm1, %v1632_v45 }
0x16cc   : > { %v1653_v46 = vld [vmem:[#allocation5 + $0x38] sm:$0xff] }
0x16cd   : > { %2293 = vmatmul.mubr.msk.f32.gmra.mrb[16].mxu0 %vm448_vm1, %v1653_v46 }
0x16fc   : > { %v1797_v25 = vpop.xlane.xlu0 %1796 }
0x16fd   : > { %v3355_v49 = vsub.f32 %v1761_v41, %v1797_v25  ;;  %v1634_v25 = vmul.f32 %v1633_v47, %v1626_v39 }
0x16ff   : > { %v1820_v53 = vmul.f32 1.442695, %v3355_v49 }
0x1700   : > { %v1799_v50 = vpop.xlane.xlu0 %1798 }
0x1701   : > { %v3363_v55 = vsub.f32 %v1766_v42, %v1799_v50  ;;  %2528 = vpow2.f32 %v1820_v53 }
0x1702   : > { %2530 = vpow2.f32 %v1818_v29 }
0x1703   : > { %v1822_v59 = vmul.f32 1.442695, %v3363_v55  ;;  %2532 = vpow2.f32 %v1824_v57 }
0x1704   : > { %v1803_v56 = vpop.xlane.xlu0 %1802 }
0x1705   : > { %v3369_v60 = vsub.f32 %v1776_v43, %v1803_v56  ;;  %2534 = vpow2.f32 %v1822_v59 }
0x1706   : > { %2536 = vpow2.f32 %v1828_v61 }
0x1707   : > { %v1826_v63 = vmul.f32 1.442695, %v3369_v60 }
0x1709   : > { %2538 = vpow2.f32 %v1826_v63 }
0x170b   : > { %v2529_v3 = vpop.eup %2528 }
0x170c   : > { %v2531_v4 = vpop.eup %2530 }
0x170d   : > { %v2533_v13 = vpop.eup %2532 }
0x170f   : > { %v2535_v6 = vpop.eup %2534 }
0x1710   : > { %v2537_v21 = vpop.eup %2536 }
0x1713   : > { %v2539_v15 = vpop.eup %2538 }
0x17a0   : > { %v2294_v62 = vpop.f32.mrb[16].mxu0 }
0x17a1   : > { %v1791_v0 = vadd.f32 %v2294_v62, %v3323_v27  ;;  %v1785_v1 = vpop.f32.mrb[17].mxu0 }
0x17a2   : > { %v1786_v2 = vadd.f32 %v3323_v27, %v1785_v1 }
0x17a3   : > { %1808 = vmax.xlane.f32.xlu1 %v1791_v0 }
0x17a4   : > { %1806 = vmax.xlane.f32.xlu0 %v1786_v2 }
0x17a7   : > { %1836 = vadd.xlane.f32.xlu1 %v2529_v3 }
0x17a8   : > { %1834 = vadd.xlane.f32.xlu0 %v2531_v4 }
0x17ab   : > { %1840 = vadd.xlane.f32.xlu1 %v2533_v13 }
0x17ac   : > { %1838 = vadd.xlane.f32.xlu0 %v2535_v6 }
0x17af   : > { %1844 = vadd.xlane.f32.xlu1 %v2537_v21 }
0x17b0   : > { %1842 = vadd.xlane.f32.xlu0 %v2539_v15 }
0x1830   : > { %v1809_v7 = vpop.xlane.xlu1 %1808 }
0x1831   : > { %v3375_v20 = vsub.f32 %v1791_v0, %v1809_v7  ;;  %v1807_v23 = vpop.xlane.xlu0 %1806 }
0x1832   : > { %v3377_v8 = vsub.f32 %v1786_v2, %v1807_v23 }
0x1833   : > { %v1832_v9 = vmul.f32 1.442695, %v3375_v20 }
0x1834   : > { %v1830_v10 = vmul.f32 1.442695, %v3377_v8  ;;  %v1837_v11 = vpop.xlane.xlu1 %1836 }
0x1835   : > { %2540 = vpow2.f32 %v1832_v9  ;;  %v1835_v12 = vpop.xlane.xlu0 %1834 }
0x1836   : > { %2542 = vpow2.f32 %v1830_v10 }
0x1837   : > { %2544 = vlog2.f32 %v1837_v11 }
0x1838   : > { %2546 = vlog2.f32 %v1835_v12  ;;  %v1841_v14 = vpop.xlane.xlu1 %1840 }
0x1839   : > { %2548 = vlog2.f32 %v1841_v14  ;;  %v1839_v16 = vpop.xlane.xlu0 %1838 }
0x183a   : > { %2550 = vlog2.f32 %v1839_v16 }
0x183c   : > { %v1845_v17 = vpop.xlane.xlu1 %1844 }
0x183d   : > { %2552 = vlog2.f32 %v1845_v17  ;;  %v1843_v18 = vpop.xlane.xlu0 %1842 }
0x183e   : > { %2554 = vlog2.f32 %v1843_v18 }
0x183f   : > { %v2541_v19 = vpop.eup %2540 }
0x1840   : > { %v2543_v22 = vpop.eup %2542  ;;  %1848 = vadd.xlane.f32.xlu1 %v2541_v19 }
0x1841   : > { %v2545_v27 = vpop.eup %2544  ;;  %1846 = vadd.xlane.f32.xlu0 %v2543_v22 }
0x1842   : > { %v2547_v28 = vpop.eup %2546  ;;  %v1853_v24 = vmul.f32 0.6931472, %v2545_v27 }
0x1843   : > { %v2549_v26 = vpop.eup %2548  ;;  %v1851_v31 = vmul.f32 0.6931472, %v2547_v28 }
0x1844   : > { %v2551_v32 = vpop.eup %2550  ;;  %v1867_v34 = vsub.f32 %v3355_v49, %v1853_v24  ;;  %v1857_v35 = vmul.f32 0.6931472, %v2549_v26 }
0x1845   : > { %v1866_v36 = vsub.f32 %v3357_v51, %v1851_v31  ;;  %v1855_v37 = vmul.f32 0.6931472, %v2551_v32 }
0x1846   : > { %1875 = vst [vmem:[%s3102_s21 + $0x8] sm:$0xff] %v1867_v34  ;;  %v1869_v38 = vsub.f32 %v3359_v52, %v1857_v35 }
0x1847   : > { %v2553_v40 = vpop.eup %2552  ;;  %1874 = vst [vmem:[%s3102_s21] sm:$0xff] %v1866_v36  ;;  %v1868_v41 = vsub.f32 %v3363_v55, %v1855_v37 }
0x1848   : > { %v2555_v42 = vpop.eup %2554  ;;  %1877 = vst [vmem:[%s3102_s21 + $0x18] sm:$0xff] %v1869_v38  ;;  %v1861_v43 = vmul.f32 0.6931472, %v2553_v40 }
0x1849   : > { %1876 = vst [vmem:[%s3102_s21 + $0x10] sm:$0xff] %v1868_v41  ;;  %v1859_v44 = vmul.f32 0.6931472, %v2555_v42 }
0x184a   : > { %v1871_v45 = vsub.f32 %v3366_v58, %v1861_v43 }
0x184b   : > { %v1870_v46 = vsub.f32 %v3369_v60, %v1859_v44 }
0x184c   : > { %1879 = vst [vmem:[%s3102_s21 + $0x28] sm:$0xff] %v1871_v45 }
0x184d   : > { %1878 = vst [vmem:[%s3102_s21 + $0x20] sm:$0xff] %v1870_v46 }
0x1857   : > { %1636 = vrot.lane.b32.xlu0 %v1634_v25, %s2817_s28 }
0x1858   : > { %2687 = shalt.err (!%p2684_p13)
}
0x1859   : > { %s2688_s25 = scalar_lea.hbm %s3505_s9, 128  ;;  %p3534_p2 = pmov %p3533_p9 }
0x185a   : > { %p2689_p1 = scmp.ne.s32.totalorder %s3505_s9, %s2688_s25  ;;  %p2694_p3 = scmp.lt.u32.totalorder %s2688_s25, %s3505_s9 }
0x185c   : > { %p2690_p4 = pnand %p2689_p1, %p3534_p2 }
0x185e   : > { %p2691_p10 = pneg %p2690_p4 }
0x1860   : > { %p2696_p12 = pnand %p2694_p3, %p2691_p10 }
0x1862   : > { %2699 = shalt.err (!%p2696_p12)
}
0x1863   : > { %p3535_p9 = pmov %p3534_p2  ;;  %s2819_s29 = smov [#allocation17]  }
0x1864   : > { %s1921_s24 = sshll.u32 %s2819_s29, 4  ;;  %p3536_p6 = pmov %p3534_p2  ;;  %s1922_s24 = int_to_ptr.vmem [resolvable:$true] %s1921_s24 }
0x1865   : > { %2379 = dma.vmem_to_hbm [thread:$0]  (%p3535_p9), %s1911_s18, 128, %s3505_s9, [#allocation16]  }
0x1866   : > { %s2700_s27 = scalar_lea.vmem %s1922_s24, 128  ;;  %p2707_p7 = scmp.lt.s32.totalorder %s1922_s24, %s1922_s24 }
0x1867   : > { %p2701_p0 = scmp.ne.s32.totalorder %s1922_s24, %s2700_s27  ;;  %p2708_p13 = scmp.lt.s32.totalorder %s2700_s27, %s2700_s27 }
0x1869   : > { %p2702_p8 = pnand %p2701_p0, %p3536_p6  ;;  %p2709_p1 = por %p2708_p13, %p2707_p7 }
0x186b   : > { %p2703_p11 = pneg %p2702_p8 }
0x186d   : > { %p2710_p2 = pnand %p2709_p1, %p2703_p11 }
0x18cd   : > { %v1849_v30 = vpop.xlane.xlu1 %1848 }
0x18ce   : > { %2556 = vlog2.f32 %v1849_v30  ;;  %v1847_v33 = vpop.xlane.xlu0 %1846 }
0x18cf   : > { %2558 = vlog2.f32 %v1847_v33 }
0x18d2   : > { %v1637_v39 = vpop.permute.xlu0 %1636 }
0x18d3   : > { %v1639_v48 = vadd.f32 %v1637_v39, %v3306_v5 }
0x18d5   : > { %1643 = vst.msk [vmem:[#allocation3] sm:$0xff] %vm448_vm1, %v1639_v48  ;;  %1645 = vst.msk [vmem:[#allocation17] sm:$0xff] %vm448_vm1, %v1639_v48 }
0x18d6   : > { %2713 = shalt.err (!%p2710_p2)
}
0x18d7   : > { %s3537_s8 = sld [smem:[#allocation26_spill]]  ;;  %p3538_p10 = pmov %p3536_p6 }
0x18dd   : > { %s2714_s25 = scalar_lea.hbm %s3537_s8, 128 }
0x18de   : > { %p2715_p4 = scmp.ne.s32.totalorder %s3537_s8, %s2714_s25  ;;  %p2720_p9 = scmp.lt.u32.totalorder %s2714_s25, %s3537_s8 }
0x18e0   : > { %p2716_p3 = pnand %p2715_p4, %p3538_p10 }
0x18e2   : > { %p2717_p12 = pneg %p2716_p3 }
0x18e4   : > { %p2722_p0 = pnand %p2720_p9, %p2717_p12 }
0x18e6   : > { %2725 = shalt.err (!%p2722_p0)
}
0x18e7   : > { %2381 = dma.vmem_to_hbm [thread:$0]  (%p3536_p6), %s1922_s24, 128, %s3537_s8, [#allocation16]   ;;  %v2557_v5 = vpop.eup %2556 }
0x18e8   : > { %s2102_s29 = sshll.u32 %s2899_s17, 10  ;;  %s1896_s27 = sshll.u32 %s3102_s21, 4  ;;  %v2559_v49 = vpop.eup %2558  ;;  %v1865_v50 = vmul.f32 0.6931472, %v2557_v5  ;;  %s3445_s27 = int_to_ptr.vmem [resolvable:$true] %s1896_s27 }
0x18e9   : > { %v1863_v51 = vmul.f32 0.6931472, %v2559_v49  ;;  %s3539_s25 = sld [smem:[#allocation25_spill]]  ;;  %s1883_s24 = scalar_lea.sflag [#allocation8], %s3084_s10 }
0x18ea   : > { %v1873_v52 = vsub.f32 %v3375_v20, %v1865_v50  ;;  %s2726_s28 = scalar_lea.vmem %s3445_s27, 1024  ;;  %s2820_s30 = smov [#allocation14]  }
0x18eb   : > { %v1872_v53 = vsub.f32 %v3377_v8, %v1863_v51  ;;  %p2727_p8 = scmp.ne.s32.totalorder %s3445_s27, %s2726_s28  ;;  %s2730_s19 = sshll.u32 %s2820_s30, 4  ;;  %s2731_s19 = int_to_ptr.vmem [resolvable:$false] %s2730_s19 }
0x18ec   : > { %1881 = vst [vmem:[%s3102_s21 + $0x38] sm:$0xff] %v1873_v52  ;;  %s2732_s11 = scalar_lea.vmem %s2731_s19, 2048  ;;  %p2733_p13 = scmp.lt.s32.totalorder %s3445_s27, %s2731_s19 }
0x18ed   : > { %1880 = vst [vmem:[%s3102_s21 + $0x30] sm:$0xff] %v1872_v53  ;;  %p2728_p11 = pnand %p2727_p8, %p3033_p5  ;;  %p2734_p1 = scmp.lt.s32.totalorder %s2732_s11, %s2726_s28 }
0x18ef   : > { %s3443_s23 = scalar_lea.hbm %s3539_s25, %s2102_s29  ;;  %p2729_p7 = pneg %p2728_p11 }
0x18f0   : > { %p2735_p2 = por %p2734_p1, %p2733_p13 }
0x18f2   : > { %p2736_p4 = pnand %p2735_p2, %p2729_p7 }
0x18f4   : > { %2739 = shalt.err (!%p2736_p4)
}
0x18f5   : > { %s2740_s21 = scalar_lea.hbm %s3443_s23, 1024  ;;  %s2744_s18 = scalar_lea.hbm %s3539_s25, 2048 }
0x18f6   : > { %p2741_p10 = scmp.ne.s32.totalorder %s3443_s23, %s2740_s21  ;;  %p2745_p9 = scmp.lt.u32.totalorder %s3443_s23, %s3539_s25 }
0x18f7   : > { %p2746_p0 = scmp.lt.u32.totalorder %s2744_s18, %s2740_s21  ;;  %p2748_p8 = scmp.lt.u32.totalorder %s2740_s21, %s3443_s23 }
0x18f8   : > { %p2742_p3 = pnand %p2741_p10, %p3033_p5 }
0x18f9   : > { %p2747_p6 = por %p2746_p0, %p2745_p9 }
0x18fa   : > { %p2743_p12 = pneg %p2742_p3 }
0x18fb   : > { %p2749_p11 = por %p2748_p8, %p2747_p6 }
0x18fd   : > { %p2750_p7 = pnand %p2749_p11, %p2743_p12 }
0x18ff   : > { %2753 = shalt.err (!%p2750_p7)
}
0x1900   : > { %s2821_s28 = smov 128   ;;  %s2822_s19 = smov 8  }
0x1901   : > { %2377 = dma.vmem_to_hbm [thread:$0]  (%p3033_p5), %s3445_s27, 1024, %s3443_s23, %s1883_s24, %s2821_s28, %s2821_s28, %s2822_s19  }
0x1902   : > { %p3540_p13 = scmp.eq.s32.totalorder %s2899_s17, 1 }
0x1904   : > { %2783 = dma.done.wait (%p3540_p13), [#allocation16], 256   ;;  %p3541_p1 = pmov %p3540_p13 }
0x1906   : > { %2785 = vsyncadd (%p3541_p1), [#allocation16], 4294967040 }
0x1907 PF: > { %s3542_s11 = sld [smem:[#allocation23_spill]]  ;;  %s3543_s21 = sld [smem:[#allocation24_spill]] }
0x1908   : > { %p3545_p4 = scmp.ge.s32.totalorder %s2804_s16, 2 }
0x190d   : > { %s1941_s12 = sand.u32 1, %s3542_s11   ;;  %p3544_p2 = scmp.ne.s32.totalorder %s3543_s21, 0 }
0x190e   : > { %s1942_s29 = scalar_lea.sflag [#allocation8], %s1941_s12 }
0x190f   : > { %p2402_p10 = pnand %p3545_p4, %p3544_p2 }
0x1911   : > { %2787 = dma.done.wait (!%p2402_p10), %s1942_s29, 1024  }
0x1912   : > { %2789 = vsyncadd (!%p2402_p10), %s1942_s29, 4294966272  ;;  %s3546_s20 = smov %s3029_s13  ;;  %p27_p5 = scmp.ge.s32.totalorder %s3019_s22, 4  }
0x1913   : > { %s3547_s13 = smov %s2796_s14  ;;  %s3548_s14 = smov %s2800_s15 }
0x1914   : > { %s3549_s15 = smov %s3546_s20  ;;  %s3550_s16 = smov %s3019_s22 }
0x1915   :  { %29 = sbr.rel (!%p27_p5) target bundleno = 11 (0xb), region = 143 }
0x191c   :  { %1947 = vsyncpa [#allocation7], 1 }
0x191d   :  { %1949 = vsyncpa [#allocation7 + $0x1], 1 }
0x191e   :  { %1950 = vsyncpa [#allocation10], 1 }
0x191f   :  { %1951 = vsyncpa [#allocation13], 1 }
0x1920   :  { %1952 = vsyncpa [#allocation8], 1 }
0x1921   :  { %1954 = vsyncpa [#allocation8 + $0x1], 1 }
0x1922   :  { %1955 = vsyncpa [#allocation16], 1 }

</bundles_post_ra>
